<compile_context>
chip_gen: v7x
topology: tpu7x:2x2x1
jax: 0.10.0
libtpu: 0.0.40
codegen_flags: <defaults>
</compile_context>

<pallas_src>
import functools

import jax
import jax.numpy as jnp
import numpy as np
from jax.experimental import pallas as pl
from jax.experimental.pallas import tpu as pltpu

_LANE = 128
_SUBLANE = 8


# ----------------------------- VMEM budgeting --------------------------------

@functools.lru_cache(maxsize=1)
def _vmem_limit_bytes():
    """Generation-aware scoped-VMEM request (v7x: 64 MiB physical, v5e/v6e: 128 MiB)."""
    phys = None
    try:
        phys = getattr(pltpu.get_tpu_info(), "vmem_capacity_bytes", None)
    except Exception:
        phys = None
    if not phys:
        phys = 128 * 1024 * 1024
    return int(min(phys * 3 // 4, 96 * 1024 * 1024))


def _tile_budget_bytes():
    # Total per-step working set (double-buffering is counted explicitly by the callers).
    return (_vmem_limit_bytes() * 3) // 5


@functools.lru_cache(maxsize=1)
def _compiler_params():
    return pltpu.CompilerParams(dimension_semantics=("parallel",),
                                vmem_limit_bytes=_vmem_limit_bytes())


def _row_bytes(width, dtype):
    """Bytes per row of a (tm, width) VMEM block, including 128-lane padding."""
    lanes = -(-int(width) // _LANE) * _LANE
    return lanes * jnp.dtype(dtype).itemsize


def _block_bytes(rows, width, dtype):
    return (-(-int(rows) // _SUBLANE) * _SUBLANE) * _row_bytes(width, dtype)


def _pick_tile_rows(m, per_row_bytes, fixed_bytes=0):
    """Largest row tile that divides m, is a sublane multiple, keeps the double-buffered
    working set under budget, and leaves >=2 grid steps when possible (v7x has 2 TCs)."""
    budget = _tile_budget_bytes() - int(fixed_bytes)
    cap = max(budget // max(int(per_row_bytes), 1), _SUBLANE)
    if m >= 2 * _SUBLANE and m % 2 == 0:
        cap = min(cap, m // 2)
    cap = min(cap, m)
    best = 0
    i = 1
    while i * i <= m:
        if m % i == 0:
            for d in (i, m // i):
                if d <= cap and d % _SUBLANE == 0 and d > best:
                    best = d
        i += 1
    # TODO(synk): pad m up to a tileable multiple instead of falling back to one oversized block.
    return best if best > 0 else m


def _pack_factor(c, m):
    """Lane-packing factor r: view (M, C) as (M//r, r*C) so blocks are lane-dense."""
    if c >= _LANE or _LANE % c != 0:
        return 1
    r = _LANE // c
    while r > 1 and m % (r * _SUBLANE) != 0:
        r //= 2
    return r


# ----------------------------- Pallas kernels --------------------------------

def _matmul_bias_kernel(x_ref, w_ref, b_ref, o_ref):
    o_ref[...] = (jnp.dot(x_ref[...], w_ref[...], preferred_element_type=jnp.float32)
                  + b_ref[...]).astype(o_ref.dtype)


def _matmul_bias_relu_kernel(x_ref, w_ref, b_ref, o_ref):
    # Folded BN1 + combine_gates conv + BN2 + ReLU: one bf16 MXU matmul, f32 accumulate.
    z = jnp.dot(x_ref[...], w_ref[...], preferred_element_type=jnp.float32) + b_ref[...]
    o_ref[...] = jnp.maximum(z, 0.0).astype(o_ref.dtype)


def _attention_kernel(xp_ref, wth_ref, phi_ref, psi_ref, bpsi_ref, att_ref):
    # theta = lane-packed patches @ block-diag(W_theta) (bf16 MXU, f32 acc);
    # f = relu(theta + phi); the per-patch psi dot is a second small MXU matmul so the
    # output stays lane-packed (tm, r) instead of a heavily masked (tm*r, 1) store.
    theta = jnp.dot(xp_ref[...], wth_ref[...], preferred_element_type=jnp.float32)
    f = jnp.maximum(theta + phi_ref[...], 0.0)
    s = jnp.dot(f, psi_ref[...], preferred_element_type=jnp.float32) + bpsi_ref[...]
    att_ref[...] = jax.nn.sigmoid(s)


def _gate_conv_stats_kernel(x_ref, att_ref, e_ref, w_ref, b_ref, wy_ref, sum_ref, gram_ref):
    # att lane-expansion via a tiny 0/1 matmul (MXU), gating multiply on the VPU,
    # 1x1x1 W conv as a block-diagonal bf16 matmul, then fused BN statistics:
    # per-tile column sums and the gram wy0^T @ wy0 (MXU), combined/unfolded in JAX.
    att_e = jnp.dot(att_ref[...], e_ref[...],
                    preferred_element_type=jnp.float32).astype(x_ref.dtype)
    y = x_ref[...] * att_e
    wy0 = jnp.dot(y, w_ref[...], preferred_element_type=jnp.float32)   # bias-free (shifted stats)
    wy_ref[...] = (wy0 + b_ref[...]).astype(wy_ref.dtype)
    sum_ref[...] = jnp.sum(wy0, axis=0, keepdims=True)[None]
    gram_ref[...] = jax.lax.dot_general(
        wy0, wy0, (((0,), (0,)), ((), ())), preferred_element_type=jnp.float32)[None]


# ----------------------------- kernel wrappers --------------------------------

def matmul_bias(x, w, b, out_dtype=jnp.float32):
    m, k = x.shape
    n = w.shape[1]
    per_row = 2 * (_row_bytes(k, x.dtype) + _row_bytes(n, out_dtype))
    fixed = 2 * (_block_bytes(k, n, w.dtype) + _block_bytes(1, n, b.dtype))
    tm = _pick_tile_rows(m, per_row, fixed)
    return pl.pallas_call(
        _matmul_bias_kernel,
        out_shape=jax.ShapeDtypeStruct((m, n), out_dtype),
        grid=(m // tm,),
        in_specs=[pl.BlockSpec((tm, k), lambda i: (i, 0)),
                  pl.BlockSpec((k, n), lambda i: (0, 0)),
                  pl.BlockSpec((1, n), lambda i: (0, 0))],
        out_specs=pl.BlockSpec((tm, n), lambda i: (i, 0)),
        compiler_params=_compiler_params(),
    )(x, w, b.reshape(1, n))


def attention_scores(xp2, wth_bd, phi2, psi_bd, b_psi):
    m, kk = xp2.shape
    lw = wth_bd.shape[1]
    rp = psi_bd.shape[1]
    per_row = 2 * (_row_bytes(kk, xp2.dtype) + _row_bytes(lw, phi2.dtype)
                   + _row_bytes(rp, jnp.float32))
    fixed = 2 * (_block_bytes(kk, lw, wth_bd.dtype) + _block_bytes(lw, rp, psi_bd.dtype)
                 + _block_bytes(1, 1, jnp.float32))
    tm = _pick_tile_rows(m, per_row, fixed)
    return pl.pallas_call(
        _attention_kernel,
        out_shape=jax.ShapeDtypeStruct((m, rp), jnp.float32),
        grid=(m // tm,),
        in_specs=[pl.BlockSpec((tm, kk), lambda i: (i, 0)),
                  pl.BlockSpec((kk, lw), lambda i: (0, 0)),
                  pl.BlockSpec((tm, lw), lambda i: (i, 0)),
                  pl.BlockSpec((lw, rp), lambda i: (0, 0)),
                  pl.BlockSpec((1, 1), lambda i: (0, 0))],
        out_specs=pl.BlockSpec((tm, rp), lambda i: (i, 0)),
        compiler_params=_compiler_params(),
    )(xp2, wth_bd, phi2, psi_bd, b_psi.reshape(1, 1))


def gate_conv_stats(x2, att_r, e_mat, w_bd, b_bd, out_dtype=jnp.bfloat16):
    m, lw = x2.shape
    r = att_r.shape[1]
    per_row = 2 * (_row_bytes(lw, x2.dtype) + _row_bytes(r, att_r.dtype)
                   + _row_bytes(lw, out_dtype))
    fixed = 2 * (_block_bytes(r, lw, e_mat.dtype) + _block_bytes(lw, lw, w_bd.dtype)
                 + _block_bytes(1, lw, b_bd.dtype) + _block_bytes(1, lw, jnp.float32)
                 + _block_bytes(lw, lw, jnp.float32))
    tm = _pick_tile_rows(m, per_row, fixed)
    g = m // tm
    return pl.pallas_call(
        _gate_conv_stats_kernel,
        out_shape=(jax.ShapeDtypeStruct((m, lw), out_dtype),
                   jax.ShapeDtypeStruct((g, 1, lw), jnp.float32),
                   jax.ShapeDtypeStruct((g, lw, lw), jnp.float32)),
        grid=(g,),
        in_specs=[pl.BlockSpec((tm, lw), lambda i: (i, 0)),
                  pl.BlockSpec((tm, r), lambda i: (i, 0)),
                  pl.BlockSpec((r, lw), lambda i: (0, 0)),
                  pl.BlockSpec((lw, lw), lambda i: (0, 0)),
                  pl.BlockSpec((1, lw), lambda i: (0, 0))],
        out_specs=(pl.BlockSpec((tm, lw), lambda i: (i, 0)),
                   pl.BlockSpec((1, 1, lw), lambda i: (i, 0, 0)),
                   pl.BlockSpec((1, lw, lw), lambda i: (i, 0, 0))),
        compiler_params=_compiler_params(),
    )(x2, att_r, e_mat, w_bd, b_bd)


def matmul_bias_relu(x2, w_bd, b_bd):
    m, lw = x2.shape
    per_row = 2 * (_row_bytes(lw, x2.dtype) + _row_bytes(lw, jnp.float32))
    fixed = 2 * (_block_bytes(lw, lw, w_bd.dtype) + _block_bytes(1, lw, b_bd.dtype))
    tm = _pick_tile_rows(m, per_row, fixed)
    return pl.pallas_call(
        _matmul_bias_relu_kernel,
        out_shape=jax.ShapeDtypeStruct((m, lw), jnp.float32),
        grid=(m // tm,),
        in_specs=[pl.BlockSpec((tm, lw), lambda i: (i, 0)),
                  pl.BlockSpec((lw, lw), lambda i: (0, 0)),
                  pl.BlockSpec((1, lw), lambda i: (0, 0))],
        out_specs=pl.BlockSpec((tm, lw), lambda i: (i, 0)),
        compiler_params=_compiler_params(),
    )(x2, w_bd, b_bd)


# ------------------------------- JAX glue ------------------------------------

def extract_patches(x_cl, sub):
    """Non-overlapping patches == strided conv with kernel=stride=sub, padding=0."""
    n, d, h, w, c = x_cl.shape
    sd, sh, sw = sub
    dt, ht, wt = d // sd, h // sh, w // sw
    xp = x_cl.reshape(n, dt, sd, ht, sh, wt, sw, c)
    xp = xp.transpose(0, 1, 3, 5, 2, 4, 6, 7)           # (n, dt, ht, wt, sd, sh, sw, c)
    return xp.reshape(n * dt * ht * wt, sd * sh * sw * c), (dt, ht, wt)


def _upsample2x_axis(x, axis):
    # Exact factor-2 trilinear (align_corners=False) with static 0.25/0.75 weights,
    # expressed as shift + lerp + interleave — no gathers.
    x = jnp.moveaxis(x, axis, 0)
    x_prev = jnp.concatenate([x[:1], x[:-1]], axis=0)
    x_next = jnp.concatenate([x[1:], x[-1:]], axis=0)
    even = 0.25 * x_prev + 0.75 * x
    odd = 0.75 * x + 0.25 * x_next
    out = jnp.stack([even, odd], axis=1).reshape((2 * x.shape[0],) + x.shape[1:])
    return jnp.moveaxis(out, 0, axis)


def _linear_resize_axis(x, out_size, axis):
    # General gather + lerp fallback (only for factors other than 1x / 2x).
    in_size = x.shape[axis]
    scale = in_size / out_size
    idx = jnp.arange(out_size, dtype=jnp.float32)
    src = jnp.maximum((idx + 0.5) * scale - 0.5, 0.0)    # PyTorch align_corners=False clamp
    lo = jnp.minimum(jnp.floor(src).astype(jnp.int32), in_size - 1)
    hi = jnp.minimum(lo + 1, in_size - 1)
    frac = src - lo.astype(jnp.float32)
    shape = [1] * x.ndim
    shape[axis] = out_size
    frac = frac.reshape(shape)
    return jnp.take(x, lo, axis=axis) * (1.0 - frac) + jnp.take(x, hi, axis=axis) * frac


def trilinear_resize(x, size):
    # Matches F.interpolate(mode='trilinear', align_corners=False).
    for axis, s in zip((1, 2, 3), size):
        in_size = x.shape[axis]
        if s == in_size:
            continue
        if s == 2 * in_size:
            x = _upsample2x_axis(x, axis)
        else:
            # TODO(synk): gather-based fallback for arbitrary (non-2x) resize factors.
            x = _linear_resize_axis(x, s, axis)
    return x


# ------------------------------ forward pass ----------------------------------

def multi_attention_block(x_cl, g_cl, p, sub=(2, 2, 2), eps=1e-5):
    n, d, h, w, cin = x_cl.shape
    _, dg, hg, wg, cg = g_cl.shape
    ci = p["phi_w2d"].shape[1]

    x_bf = x_cl.astype(jnp.bfloat16)     # one bf16 copy; halves every downstream read of x

    # --- GridAttentionBlock3D, mode='concatenation' ---
    # TODO(synk): the patch extraction still materializes a transposed copy of x in HBM;
    # a per-offset strided decomposition of the theta conv would remove it entirely.
    xp, (dt, ht, wt) = extract_patches(x_bf, sub)            # (Mp, K) bf16
    mp, kpatch = xp.shape
    rp = _pack_factor(ci, mp)

    phi_g = matmul_bias(g_cl.reshape(-1, cg), p["phi_w2d"], p["phi_b"])
    phi_up = trilinear_resize(phi_g.reshape(n, dg, hg, wg, ci), (dt, ht, wt))

    eye_p = jnp.eye(rp, dtype=jnp.float32)
    wth_bd = jnp.kron(eye_p, p["theta_w2d"]).astype(jnp.bfloat16)       # (rp*K, rp*Ci)
    psi_bd = jnp.kron(eye_p, p["psi_w2d"].reshape(ci, 1))               # (rp*Ci, rp)

    # fused: theta conv + add + relu + psi + sigmoid, lane-packed output
    att2 = attention_scores(xp.reshape(mp // rp, rp * kpatch), wth_bd,
                            phi_up.reshape(mp // rp, rp * ci), psi_bd, p["psi_b"])
    att_up = trilinear_resize(att2.reshape(n, dt, ht, wt, 1), (d, h, w))   # attention_1

    # --- y = att * x ; W conv (block-diag, lane-dense) ; fused shifted BN1 statistics ---
    m = n * d * h * w
    r = _pack_factor(cin, m)
    lw = r * cin
    eye_r = jnp.eye(r, dtype=jnp.float32)
    e_mat = jnp.kron(eye_r, jnp.ones((1, cin), jnp.float32))            # att lane expander
    w_bd = jnp.kron(eye_r, p["W_w"]).astype(jnp.bfloat16)               # block-diag W conv
    b_bd = jnp.tile(p["W_b"], r).reshape(1, lw)

    wy2, psum, pgram = gate_conv_stats(x_bf.reshape(m // r, lw),
                                       att_up.reshape(m // r, r), e_mat, w_bd, b_bd)

    # fold the r lane groups of the per-tile statistics back to per-channel form
    sum0 = psum.sum(axis=(0, 1)).reshape(r, cin).sum(axis=0)                      # (cin,)
    gram0 = (pgram.sum(axis=0).reshape(r, cin, r, cin)
             * eye_r[:, None, :, None]).sum(axis=(0, 2))                          # (cin, cin)

    # --- BN1 -> combine_gates conv -> BN2 (training batch stats), fully folded ---
    mf = jnp.float32(m)
    m0 = sum0 / mf                           # mean of bias-free wy (shifted statistics)
    mean1 = m0 + p["W_b"]
    cov1 = gram0 / mf - jnp.outer(m0, m0)    # Cov(wy); constant bias shift cancels
    var1 = jnp.maximum(jnp.diag(cov1), 0.0)
    scale1 = p["W_bn_g"] / jnp.sqrt(var1 + eps)
    shift1 = p["W_bn_b"] - mean1 * scale1

    w2 = scale1[:, None] * p["cg_w"]         # BN1 folded into the combine_gates conv weight
    b2 = shift1 @ p["cg_w"] + p["cg_b"]
    mean2 = mean1 @ w2 + b2                  # analytic BN2 batch statistics (no z HBM pass)
    var2 = jnp.maximum(jnp.diag(w2.T @ cov1 @ w2), 0.0)
    scale2 = p["cg_bn_g"] / jnp.sqrt(var2 + eps)
    shift2 = p["cg_bn_b"] - mean2 * scale2

    w3_bd = jnp.kron(eye_r, w2 * scale2[None, :]).astype(jnp.bfloat16)
    b3_bd = jnp.tile(b2 * scale2 + shift2, r).reshape(1, lw)

    # NOTE: statistics come from the in-kernel f32 values; the final matmul reads the
    # bf16-rounded wy (small systematic mismatch, covered by the test tolerance).
    out = matmul_bias_relu(wy2, w3_bd, b3_bd)        # reads wy once, writes out directly
    return out.reshape(n, d, h, w, cin), att_up


# ---------------------------- parameter init ----------------------------------

def init_params(key, in_size, gate_size, inter_size, sub):
    kd, kh, kw = sub
    ks = jax.random.split(key, 8)

    def kaiming(kk, shape, fan_in):
        return jax.random.normal(kk, shape, jnp.float32) * np.float32(np.sqrt(2.0 / fan_in))

    theta_w = kaiming(ks[0], (inter_size, in_size, kd, kh, kw), in_size * kd * kh * kw)
    phi_w = kaiming(ks[1], (inter_size, gate_size), gate_size)
    psi_w = kaiming(ks[2], (1, inter_size), inter_size)
    W_w = kaiming(ks[3], (in_size, in_size), in_size)
    cg_w = kaiming(ks[4], (in_size, in_size), in_size)

    return dict(
        # theta: (Cout, Cin, kd, kh, kw) -> (kd*kh*kw*Cin, Cout) to match patch ordering
        theta_w2d=jnp.transpose(theta_w, (2, 3, 4, 1, 0)).reshape(kd * kh * kw * in_size,
                                                                  inter_size),
        phi_w2d=phi_w.T, phi_b=jnp.zeros((inter_size,), jnp.float32),
        psi_w2d=psi_w.T, psi_b=jnp.zeros((1,), jnp.float32),
        W_w=W_w.T, W_b=jnp.zeros((in_size,), jnp.float32),
        W_bn_g=jnp.ones((in_size,), jnp.float32),
        W_bn_b=jnp.zeros((in_size,), jnp.float32),
        cg_w=cg_w.T, cg_b=jnp.zeros((in_size,), jnp.float32),
        cg_bn_g=1.0 + 0.02 * jax.random.normal(ks[5], (in_size,), jnp.float32),
        cg_bn_b=jnp.zeros((in_size,), jnp.float32),
    )


# ---------------------------- pure-JAX reference ------------------------------

def reference_forward(x_cl, g_cl, p, sub, eps=1e-5):
    n, d, h, w, cin = x_cl.shape
    _, dg, hg, wg, cg = g_cl.shape
    ci = p["theta_w2d"].shape[1]
    xp, (dt, ht, wt) = extract_patches(x_cl, sub)
    theta_x = xp @ p["theta_w2d"]
    phi_g = (g_cl.reshape(-1, cg) @ p["phi_w2d"] + p["phi_b"]).reshape(n, dg, hg, wg, ci)
    phi_up = trilinear_resize(phi_g, (dt, ht, wt)).reshape(-1, ci)
    f = jnp.maximum(theta_x + phi_up, 0.0)
    att = jax.nn.sigmoid(f @ p["psi_w2d"] + p["psi_b"])
    att_up = trilinear_resize(att.reshape(n, dt, ht, wt, 1), (d, h, w))
    y = (x_cl * att_up).reshape(-1, cin)
    wy = y @ p["W_w"] + p["W_b"]

    def bn(x, g, b):
        m = x.mean(0)
        v = x.var(0)
        return (x - m) / jnp.sqrt(v + eps) * g + b

    gate1 = bn(wy, p["W_bn_g"], p["W_bn_b"])
    z = gate1 @ p["cg_w"] + p["cg_b"]
    out = jnp.maximum(bn(z, p["cg_bn_g"], p["cg_bn_b"]), 0.0)
    return out.reshape(n, d, h, w, cin), att_up


# --------------------------------- main ----------------------------------------

if __name__ == "__main__":
    key = jax.random.PRNGKey(0)
    kx, kg, kp = jax.random.split(key, 3)

    # small shapes: batch=2, in_size=8, gate_size=16, inter_size=8, spatial 8^3 / gate 4^3
    N, Cin, Cg, Ci = 2, 8, 16, 8
    D = H = W = 8
    sub = (2, 2, 2)
    Dg, Hg, Wg = D // 2, H // 2, W // 2

    x = jax.random.normal(kx, (N, D, H, W, Cin), jnp.float32)
    g = jax.random.normal(kg, (N, Dg, Hg, Wg, Cg), jnp.float32)
    params = init_params(kp, Cin, Cg, Ci, sub)

    fwd = jax.jit(functools.partial(multi_attention_block, sub=sub))
    out, att = fwd(x, g, params)
    out = jax.block_until_ready(out)
    att = jax.block_until_ready(att)

    ref_out, ref_att = reference_forward(x, g, params, sub)
    # att path uses bf16 patches/theta weights; out path is bf16 activations end-to-end
    # (f32 accumulation + f32 statistics), hence the relaxed tolerances.
    np.testing.assert_allclose(np.asarray(att), np.asarray(ref_att), rtol=1e-2, atol=1e-2)
    np.testing.assert_allclose(np.asarray(out), np.asarray(ref_out), rtol=2e-2, atol=3e-2)

    print("KERNEL_OK")
</pallas_src>

<mosaic_0001>
module attributes {stable_mosaic.version = 11 : i64} {
  func.func @_matmul_bias_kernel(%arg0: i32, %arg1: memref<64x16xf32, #tpu.memory_space<vmem>>, %arg2: memref<16x8xf32, #tpu.memory_space<vmem>>, %arg3: memref<1x8xf32, #tpu.memory_space<vmem>>, %arg4: memref<64x8xf32, #tpu.memory_space<vmem>>) attributes {dimension_semantics = [#tpu.dimension_semantics<parallel>], iteration_bounds = array<i64: 2>, scalar_prefetch = 0 : i64, scratch_operands = 0 : i64, tpu.core_type = #tpu.core_type<tc>, window_params = [{transform_indices = @transform_0, window_bounds = array<i64: 64, 16>}, {pipeline_mode = #tpu.pipeline_mode<synchronous>, transform_indices = @transform_1, window_bounds = array<i64: 16, 8>}, {pipeline_mode = #tpu.pipeline_mode<synchronous>, transform_indices = @transform_2, window_bounds = array<i64: 1, 8>}, {transform_indices = @transform_3, window_bounds = array<i64: 64, 8>}]} {
    %c0 = arith.constant 0 : index
    %c0_0 = arith.constant 0 : index
    %0 = vector.load %arg1[%c0, %c0_0] : memref<64x16xf32, #tpu.memory_space<vmem>>, vector<64x16xf32>
    %c0_1 = arith.constant 0 : index
    %c0_2 = arith.constant 0 : index
    %1 = vector.load %arg2[%c0_1, %c0_2] : memref<16x8xf32, #tpu.memory_space<vmem>>, vector<16x8xf32>
    %cst = arith.constant dense<0.000000e+00> : vector<64x8xf32>
    %2 = tpu.matmul %0, %1, %cst {dimension_numbers = #tpu.dot_dimension_numbers<[1], [0], [0], [1], [0, 0, 1, 1], [], []>} : vector<64x16xf32>, vector<16x8xf32>, vector<64x8xf32> -> vector<64x8xf32>
    %c0_3 = arith.constant 0 : index
    %c0_4 = arith.constant 0 : index
    %3 = vector.load %arg3[%c0_3, %c0_4] : memref<1x8xf32, #tpu.memory_space<vmem>>, vector<1x8xf32>
    %4 = vector.broadcast %3 : vector<1x8xf32> to vector<64x8xf32>
    %5 = arith.addf %2, %4 : vector<64x8xf32>
    %c0_5 = arith.constant 0 : index
    %c0_6 = arith.constant 0 : index
    %6 = vector.load %arg4[%c0_5, %c0_6] : memref<64x8xf32, #tpu.memory_space<vmem>>, vector<64x8xf32>
    tpu.vector_store %arg4[%c0_5, %c0_6], %5 {strides = array<i32>} : memref<64x8xf32, #tpu.memory_space<vmem>>, vector<64x8xf32>,
    return
  }
  func.func @transform_0(%arg0: i32) -> (i32, i32) {
    %c0_i32 = arith.constant 0 : i32
    %c0_i32_0 = arith.constant 0 : i32
    return %arg0, %c0_i32 : i32, i32
  }
  func.func @transform_1(%arg0: i32) -> (i32, i32) {
    %c0_i32 = arith.constant 0 : i32
    %c0_i32_0 = arith.constant 0 : i32
    %c0_i32_1 = arith.constant 0 : i32
    return %c0_i32, %c0_i32_0 : i32, i32
  }
  func.func @transform_2(%arg0: i32) -> (i32, i32) {
    %c0_i32 = arith.constant 0 : i32
    %c0_i32_0 = arith.constant 0 : i32
    %c0_i32_1 = arith.constant 0 : i32
    return %c0_i32, %c0_i32_0 : i32, i32
  }
  func.func @transform_3(%arg0: i32) -> (i32, i32) {
    %c0_i32 = arith.constant 0 : i32
    %c0_i32_0 = arith.constant 0 : i32
    return %arg0, %c0_i32 : i32, i32
  }
}

module attributes {stable_mosaic.version = 11 : i64} {
  func.func @_attention_kernel(%arg0: i32, %arg1: memref<8x1024xbf16, #tpu.memory_space<vmem>>, %arg2: memref<1024x128xbf16, #tpu.memory_space<vmem>>, %arg3: memref<8x128xf32, #tpu.memory_space<vmem>>, %arg4: memref<128x16xf32, #tpu.memory_space<vmem>>, %arg5: memref<1x1xf32, #tpu.memory_space<vmem>>, %arg6: memref<8x16xf32, #tpu.memory_space<vmem>>) attributes {dimension_semantics = [#tpu.dimension_semantics<parallel>], iteration_bounds = array<i64: 1>, scalar_prefetch = 0 : i64, scratch_operands = 0 : i64, tpu.core_type = #tpu.core_type<tc>, window_params = [{transform_indices = @transform_0, window_bounds = array<i64: 8, 1024>}, {pipeline_mode = #tpu.pipeline_mode<synchronous>, transform_indices = @transform_1, window_bounds = array<i64: 1024, 128>}, {transform_indices = @transform_2, window_bounds = array<i64: 8, 128>}, {pipeline_mode = #tpu.pipeline_mode<synchronous>, transform_indices = @transform_3, window_bounds = array<i64: 128, 16>}, {pipeline_mode = #tpu.pipeline_mode<synchronous>, transform_indices = @transform_4, window_bounds = array<i64: 1, 1>}, {transform_indices = @transform_5, window_bounds = array<i64: 8, 16>}]} {
    %c0 = arith.constant 0 : index
    %c0_0 = arith.constant 0 : index
    %0 = vector.load %arg1[%c0, %c0_0] : memref<8x1024xbf16, #tpu.memory_space<vmem>>, vector<8x1024xbf16>
    %c0_1 = arith.constant 0 : index
    %c0_2 = arith.constant 0 : index
    %1 = vector.load %arg2[%c0_1, %c0_2] : memref<1024x128xbf16, #tpu.memory_space<vmem>>, vector<1024x128xbf16>
    %cst = arith.constant dense<0.000000e+00> : vector<8x128xf32>
    %2 = tpu.matmul %0, %1, %cst {dimension_numbers = #tpu.dot_dimension_numbers<[1], [0], [0], [1], [0, 0, 1, 1], [], []>} : vector<8x1024xbf16>, vector<1024x128xbf16>, vector<8x128xf32> -> vector<8x128xf32>
    %c0_3 = arith.constant 0 : index
    %c0_4 = arith.constant 0 : index
    %3 = vector.load %arg3[%c0_3, %c0_4] : memref<8x128xf32, #tpu.memory_space<vmem>>, vector<8x128xf32>
    %4 = arith.addf %2, %3 : vector<8x128xf32>
    %cst_5 = arith.constant 0.000000e+00 : f32
    %5 = vector.broadcast %cst_5 : f32 to vector<8x128xf32>
    %6 = arith.maximumf %4, %5 : vector<8x128xf32>
    %c0_6 = arith.constant 0 : index
    %c0_7 = arith.constant 0 : index
    %7 = vector.load %arg4[%c0_6, %c0_7] : memref<128x16xf32, #tpu.memory_space<vmem>>, vector<128x16xf32>
    %cst_8 = arith.constant dense<0.000000e+00> : vector<8x16xf32>
    %8 = tpu.matmul %6, %7, %cst_8 {dimension_numbers = #tpu.dot_dimension_numbers<[1], [0], [0], [1], [0, 0, 1, 1], [], []>} : vector<8x128xf32>, vector<128x16xf32>, vector<8x16xf32> -> vector<8x16xf32>
    %c0_9 = arith.constant 0 : index
    %c0_10 = arith.constant 0 : index
    %9 = vector.load %arg5[%c0_9, %c0_10] : memref<1x1xf32, #tpu.memory_space<vmem>>, vector<1x1xf32>
    %10 = vector.broadcast %9 : vector<1x1xf32> to vector<8x16xf32>
    %11 = arith.addf %8, %10 : vector<8x16xf32>
    %12 = arith.negf %11 : vector<8x16xf32>
    %13 = math.exp %12 : vector<8x16xf32>
    %cst_11 = arith.constant 1.000000e+00 : f32
    %14 = vector.broadcast %cst_11 : f32 to vector<8x16xf32>
    %15 = arith.addf %14, %13 : vector<8x16xf32>
    %16 = arith.divf %14, %15 : vector<8x16xf32>
    %c0_12 = arith.constant 0 : index
    %c0_13 = arith.constant 0 : index
    %17 = vector.load %arg6[%c0_12, %c0_13] : memref<8x16xf32, #tpu.memory_space<vmem>>, vector<8x16xf32>
    tpu.vector_store %arg6[%c0_12, %c0_13], %16 {strides = array<i32>} : memref<8x16xf32, #tpu.memory_space<vmem>>, vector<8x16xf32>,
    return
  }
  func.func @transform_0(%arg0: i32) -> (i32, i32) {
    %c0_i32 = arith.constant 0 : i32
    %c0_i32_0 = arith.constant 0 : i32
    return %arg0, %c0_i32 : i32, i32
  }
  func.func @transform_1(%arg0: i32) -> (i32, i32) {
    %c0_i32 = arith.constant 0 : i32
    %c0_i32_0 = arith.constant 0 : i32
    %c0_i32_1 = arith.constant 0 : i32
    return %c0_i32, %c0_i32_0 : i32, i32
  }
  func.func @transform_2(%arg0: i32) -> (i32, i32) {
    %c0_i32 = arith.constant 0 : i32
    %c0_i32_0 = arith.constant 0 : i32
    return %arg0, %c0_i32 : i32, i32
  }
  func.func @transform_3(%arg0: i32) -> (i32, i32) {
    %c0_i32 = arith.constant 0 : i32
    %c0_i32_0 = arith.constant 0 : i32
    %c0_i32_1 = arith.constant 0 : i32
    return %c0_i32, %c0_i32_0 : i32, i32
  }
  func.func @transform_4(%arg0: i32) -> (i32, i32) {
    %c0_i32 = arith.constant 0 : i32
    %c0_i32_0 = arith.constant 0 : i32
    %c0_i32_1 = arith.constant 0 : i32
    return %c0_i32, %c0_i32_0 : i32, i32
  }
  func.func @transform_5(%arg0: i32) -> (i32, i32) {
    %c0_i32 = arith.constant 0 : i32
    %c0_i32_0 = arith.constant 0 : i32
    return %arg0, %c0_i32 : i32, i32
  }
}

module attributes {stable_mosaic.version = 11 : i64} {
  func.func @_gate_conv_stats_kernel(%arg0: i32, %arg1: memref<32x128xbf16, #tpu.memory_space<vmem>>, %arg2: memref<32x16xf32, #tpu.memory_space<vmem>>, %arg3: memref<16x128xf32, #tpu.memory_space<vmem>>, %arg4: memref<128x128xbf16, #tpu.memory_space<vmem>>, %arg5: memref<1x128xf32, #tpu.memory_space<vmem>>, %arg6: memref<32x128xbf16, #tpu.memory_space<vmem>>, %arg7: memref<1x1x128xf32, #tpu.memory_space<vmem>>, %arg8: memref<1x128x128xf32, #tpu.memory_space<vmem>>) attributes {dimension_semantics = [#tpu.dimension_semantics<parallel>], iteration_bounds = array<i64: 2>, scalar_prefetch = 0 : i64, scratch_operands = 0 : i64, tpu.core_type = #tpu.core_type<tc>, window_params = [{transform_indices = @transform_0, window_bounds = array<i64: 32, 128>}, {transform_indices = @transform_1, window_bounds = array<i64: 32, 16>}, {pipeline_mode = #tpu.pipeline_mode<synchronous>, transform_indices = @transform_2, window_bounds = array<i64: 16, 128>}, {pipeline_mode = #tpu.pipeline_mode<synchronous>, transform_indices = @transform_3, window_bounds = array<i64: 128, 128>}, {pipeline_mode = #tpu.pipeline_mode<synchronous>, transform_indices = @transform_4, window_bounds = array<i64: 1, 128>}, {transform_indices = @transform_5, window_bounds = array<i64: 32, 128>}, {transform_indices = @transform_6, window_bounds = array<i64: 1, 1, 128>}, {transform_indices = @transform_7, window_bounds = array<i64: 1, 128, 128>}]} {
    %c0 = arith.constant 0 : index
    %c0_0 = arith.constant 0 : index
    %0 = vector.load %arg2[%c0, %c0_0] : memref<32x16xf32, #tpu.memory_space<vmem>>, vector<32x16xf32>
    %c0_1 = arith.constant 0 : index
    %c0_2 = arith.constant 0 : index
    %1 = vector.load %arg3[%c0_1, %c0_2] : memref<16x128xf32, #tpu.memory_space<vmem>>, vector<16x128xf32>
    %cst = arith.constant dense<0.000000e+00> : vector<32x128xf32>
    %2 = tpu.matmul %0, %1, %cst {dimension_numbers = #tpu.dot_dimension_numbers<[1], [0], [0], [1], [0, 0, 1, 1], [], []>} : vector<32x16xf32>, vector<16x128xf32>, vector<32x128xf32> -> vector<32x128xf32>
    %3 = arith.truncf %2 : vector<32x128xf32> to vector<32x128xbf16>
    %c0_3 = arith.constant 0 : index
    %c0_4 = arith.constant 0 : index
    %4 = vector.load %arg1[%c0_3, %c0_4] : memref<32x128xbf16, #tpu.memory_space<vmem>>, vector<32x128xbf16>
    %5 = arith.mulf %4, %3 : vector<32x128xbf16>
    %c0_5 = arith.constant 0 : index
    %c0_6 = arith.constant 0 : index
    %6 = vector.load %arg4[%c0_5, %c0_6] : memref<128x128xbf16, #tpu.memory_space<vmem>>, vector<128x128xbf16>
    %cst_7 = arith.constant dense<0.000000e+00> : vector<32x128xf32>
    %7 = tpu.matmul %5, %6, %cst_7 {dimension_numbers = #tpu.dot_dimension_numbers<[1], [0], [0], [1], [0, 0, 1, 1], [], []>} : vector<32x128xbf16>, vector<128x128xbf16>, vector<32x128xf32> -> vector<32x128xf32>
    %c0_8 = arith.constant 0 : index
    %c0_9 = arith.constant 0 : index
    %8 = vector.load %arg5[%c0_8, %c0_9] : memref<1x128xf32, #tpu.memory_space<vmem>>, vector<1x128xf32>
    %9 = vector.broadcast %8 : vector<1x128xf32> to vector<32x128xf32>
    %10 = arith.addf %7, %9 : vector<32x128xf32>
    %11 = arith.truncf %10 : vector<32x128xf32> to vector<32x128xbf16>
    %c0_10 = arith.constant 0 : index
    %c0_11 = arith.constant 0 : index
    %12 = vector.load %arg6[%c0_10, %c0_11] : memref<32x128xbf16, #tpu.memory_space<vmem>>, vector<32x128xbf16>
    tpu.vector_store %arg6[%c0_10, %c0_11], %11 {strides = array<i32>} : memref<32x128xbf16, #tpu.memory_space<vmem>>, vector<32x128xbf16>,
    %cst_12 = arith.constant dense<0.000000e+00> : vector<128xf32>
    %13 = vector.multi_reduction <add>, %7, %cst_12 [0] : vector<32x128xf32> to vector<128xf32>
    %14 = vector.shape_cast %13 : vector<128xf32> to vector<1x128xf32>
    %15 = vector.shape_cast %14 : vector<1x128xf32> to vector<1x1x128xf32>
    %c0_13 = arith.constant 0 : index
    %c0_14 = arith.constant 0 : index
    %c0_15 = arith.constant 0 : index
    %16 = vector.load %arg7[%c0_13, %c0_14, %c0_15] : memref<1x1x128xf32, #tpu.memory_space<vmem>>, vector<1x1x128xf32>
    tpu.vector_store %arg7[%c0_13, %c0_14, %c0_15], %15 {strides = array<i32>} : memref<1x1x128xf32, #tpu.memory_space<vmem>>, vector<1x1x128xf32>,
    %cst_16 = arith.constant dense<0.000000e+00> : vector<128x128xf32>
    %17 = tpu.matmul %7, %7, %cst_16 {dimension_numbers = #tpu.dot_dimension_numbers<[0], [0], [1], [1], [0, 1, 1, 1], [], []>} : vector<32x128xf32>, vector<32x128xf32>, vector<128x128xf32> -> vector<128x128xf32>
    %18 = vector.shape_cast %17 : vector<128x128xf32> to vector<1x128x128xf32>
    %c0_17 = arith.constant 0 : index
    %c0_18 = arith.constant 0 : index
    %c0_19 = arith.constant 0 : index
    %19 = vector.load %arg8[%c0_17, %c0_18, %c0_19] : memref<1x128x128xf32, #tpu.memory_space<vmem>>, vector<1x128x128xf32>
    tpu.vector_store %arg8[%c0_17, %c0_18, %c0_19], %18 {strides = array<i32>} : memref<1x128x128xf32, #tpu.memory_space<vmem>>, vector<1x128x128xf32>,
    return
  }
  func.func @transform_0(%arg0: i32) -> (i32, i32) {
    %c0_i32 = arith.constant 0 : i32
    %c0_i32_0 = arith.constant 0 : i32
    return %arg0, %c0_i32 : i32, i32
  }
  func.func @transform_1(%arg0: i32) -> (i32, i32) {
    %c0_i32 = arith.constant 0 : i32
    %c0_i32_0 = arith.constant 0 : i32
    return %arg0, %c0_i32 : i32, i32
  }
  func.func @transform_2(%arg0: i32) -> (i32, i32) {
    %c0_i32 = arith.constant 0 : i32
    %c0_i32_0 = arith.constant 0 : i32
    %c0_i32_1 = arith.constant 0 : i32
    return %c0_i32, %c0_i32_0 : i32, i32
  }
  func.func @transform_3(%arg0: i32) -> (i32, i32) {
    %c0_i32 = arith.constant 0 : i32
    %c0_i32_0 = arith.constant 0 : i32
    %c0_i32_1 = arith.constant 0 : i32
    return %c0_i32, %c0_i32_0 : i32, i32
  }
  func.func @transform_4(%arg0: i32) -> (i32, i32) {
    %c0_i32 = arith.constant 0 : i32
    %c0_i32_0 = arith.constant 0 : i32
    %c0_i32_1 = arith.constant 0 : i32
    return %c0_i32, %c0_i32_0 : i32, i32
  }
  func.func @transform_5(%arg0: i32) -> (i32, i32) {
    %c0_i32 = arith.constant 0 : i32
    %c0_i32_0 = arith.constant 0 : i32
    return %arg0, %c0_i32 : i32, i32
  }
  func.func @transform_6(%arg0: i32) -> (i32, i32, i32) {
    %c0_i32 = arith.constant 0 : i32
    %c0_i32_0 = arith.constant 0 : i32
    %c0_i32_1 = arith.constant 0 : i32
    return %arg0, %c0_i32, %c0_i32_0 : i32, i32, i32
  }
  func.func @transform_7(%arg0: i32) -> (i32, i32, i32) {
    %c0_i32 = arith.constant 0 : i32
    %c0_i32_0 = arith.constant 0 : i32
    %c0_i32_1 = arith.constant 0 : i32
    return %arg0, %c0_i32, %c0_i32_0 : i32, i32, i32
  }
}

module attributes {stable_mosaic.version = 11 : i64} {
  func.func @_matmul_bias_relu_kernel(%arg0: i32, %arg1: memref<32x128xbf16, #tpu.memory_space<vmem>>, %arg2: memref<128x128xbf16, #tpu.memory_space<vmem>>, %arg3: memref<1x128xf32, #tpu.memory_space<vmem>>, %arg4: memref<32x128xf32, #tpu.memory_space<vmem>>) attributes {dimension_semantics = [#tpu.dimension_semantics<parallel>], iteration_bounds = array<i64: 2>, scalar_prefetch = 0 : i64, scratch_operands = 0 : i64, tpu.core_type = #tpu.core_type<tc>, window_params = [{transform_indices = @transform_0, window_bounds = array<i64: 32, 128>}, {pipeline_mode = #tpu.pipeline_mode<synchronous>, transform_indices = @transform_1, window_bounds = array<i64: 128, 128>}, {pipeline_mode = #tpu.pipeline_mode<synchronous>, transform_indices = @transform_2, window_bounds = array<i64: 1, 128>}, {transform_indices = @transform_3, window_bounds = array<i64: 32, 128>}]} {
    %c0 = arith.constant 0 : index
    %c0_0 = arith.constant 0 : index
    %0 = vector.load %arg1[%c0, %c0_0] : memref<32x128xbf16, #tpu.memory_space<vmem>>, vector<32x128xbf16>
    %c0_1 = arith.constant 0 : index
    %c0_2 = arith.constant 0 : index
    %1 = vector.load %arg2[%c0_1, %c0_2] : memref<128x128xbf16, #tpu.memory_space<vmem>>, vector<128x128xbf16>
    %cst = arith.constant dense<0.000000e+00> : vector<32x128xf32>
    %2 = tpu.matmul %0, %1, %cst {dimension_numbers = #tpu.dot_dimension_numbers<[1], [0], [0], [1], [0, 0, 1, 1], [], []>} : vector<32x128xbf16>, vector<128x128xbf16>, vector<32x128xf32> -> vector<32x128xf32>
    %c0_3 = arith.constant 0 : index
    %c0_4 = arith.constant 0 : index
    %3 = vector.load %arg3[%c0_3, %c0_4] : memref<1x128xf32, #tpu.memory_space<vmem>>, vector<1x128xf32>
    %4 = vector.broadcast %3 : vector<1x128xf32> to vector<32x128xf32>
    %5 = arith.addf %2, %4 : vector<32x128xf32>
    %cst_5 = arith.constant 0.000000e+00 : f32
    %6 = vector.broadcast %cst_5 : f32 to vector<32x128xf32>
    %7 = arith.maximumf %5, %6 : vector<32x128xf32>
    %c0_6 = arith.constant 0 : index
    %c0_7 = arith.constant 0 : index
    %8 = vector.load %arg4[%c0_6, %c0_7] : memref<32x128xf32, #tpu.memory_space<vmem>>, vector<32x128xf32>
    tpu.vector_store %arg4[%c0_6, %c0_7], %7 {strides = array<i32>} : memref<32x128xf32, #tpu.memory_space<vmem>>, vector<32x128xf32>,
    return
  }
  func.func @transform_0(%arg0: i32) -> (i32, i32) {
    %c0_i32 = arith.constant 0 : i32
    %c0_i32_0 = arith.constant 0 : i32
    return %arg0, %c0_i32 : i32, i32
  }
  func.func @transform_1(%arg0: i32) -> (i32, i32) {
    %c0_i32 = arith.constant 0 : i32
    %c0_i32_0 = arith.constant 0 : i32
    %c0_i32_1 = arith.constant 0 : i32
    return %c0_i32, %c0_i32_0 : i32, i32
  }
  func.func @transform_2(%arg0: i32) -> (i32, i32) {
    %c0_i32 = arith.constant 0 : i32
    %c0_i32_0 = arith.constant 0 : i32
    %c0_i32_1 = arith.constant 0 : i32
    return %c0_i32, %c0_i32_0 : i32, i32
  }
  func.func @transform_3(%arg0: i32) -> (i32, i32) {
    %c0_i32 = arith.constant 0 : i32
    %c0_i32_0 = arith.constant 0 : i32
    return %arg0, %c0_i32 : i32, i32
  }
}

</mosaic_0001>

<bundles_post_ra>
// kernel: multi_attention_block.4
= control target key start
LH: loop header
LB: loop body
LE: loop exit
PB: predicated region body
PF: predicated region fallthrough
CT: control target
= control target key end

     0   :  { %8 = vsyncpa [#allocation3], 0  ;;  %s1059_s0 = inlined_call_operand.hbm [shape: f32[128,16], index: 0, kind: input, shape index: {}]   ;;  %s1060_s1 = inlined_call_operand.hbm [shape: f32[16,8], index: 1, kind: input, shape index: {}]   ;;  %s1061_s2 = inlined_call_operand.hbm [shape: f32[1,8], index: 2, kind: input, shape index: {}]   ;;  %s1062_s3 = inlined_call_operand.hbm [shape: f32[128,8], index: 3, kind: output, shape index: {}]  }
   0x1   :  { %10 = vsyncpa [#allocation3 + $0x1], 0 }
   0x2   :  { %11 = vsyncpa [#allocation6], 0 }
   0x3   :  { %12 = vsyncpa [#allocation4], 0 }
   0x4   :  { %14 = vsyncpa [#allocation4 + $0x1], 0  ;;  %s798_s12 = smov 0   ;;  %s800_s13 = smov 0  }
   0x5   :  { %s802_s14 = smov 0   ;;  %s804_s15 = smov 0  }
   0x6 LB: > { %s819_s16 = sadd.s32 4294967295, %s768_s15   ;;  %s480_s17 = sadd.s32 4294967294, %s768_s15   ;;  %s768_s15 = sphi %s804_s15, %s1082_s15   ;;  %s764_s14 = sphi %s802_s14, %s1081_s14   ;;  %s760_s13 = sphi %s800_s13, %s1080_s13   ;;  %s756_s12 = sphi %s798_s12, %s1079_s12  }
   0x7   : > { %p40_p0 = scmp.ne.s32.totalorder %s760_s13, %s756_s12  ;;  %p1063_p1 = scmp.eq.s32.totalorder %s819_s16, 0 }
   0x8   : > { %p112_p3 = scmp.eq.s32.totalorder %s480_s17, 1  ;;  %p481_p5 = scmp.ge.s32.totalorder %s768_s15, 1 }
   0x9   : > { %p828_p4 = por %p1063_p1, %p40_p0  ;;  %p119_p7 = scmp.lt.s32.totalorder %s768_s15, 3 }
   0xa   : > { %p833_p6 = por %p112_p3, %p40_p0  ;;  %s770_s21 = smov [#allocation5]  }
   0xb   : > { %s1066_s18 = scalar_select %p828_p4, 1, 0 }
   0xc   : > { %s1067_s19 = scalar_select %p833_p6, 1, 0 }
   0xd   : > { %p838_p8 = pnand %p481_p5, %p119_p7  ;;  %s131_s22 = sshll.u32 %s770_s21, 4  ;;  %s842_s22 = int_to_ptr.vmem [resolvable:$true] %s131_s22 }
   0xe   : > { %s771_s24 = smov [#allocation7]   ;;  %s612_s28 = scalar_lea.hbm %s1060_s1, 256 }
   0xf   : > { %p553_p9 = pneg %p838_p8  ;;  %s145_s25 = sshll.u32 %s771_s24, 4  ;;  %s853_s25 = int_to_ptr.vmem [resolvable:$true] %s145_s25 }
  0x10   : > { %p613_p12 = scmp.ne.s32.totalorder %s1060_s1, %s612_s28  ;;  %p619_p5 = scmp.lt.u32.totalorder %s612_s28, %s1060_s1 }
  0x11   : > { %p849_p11 = pnand %p553_p9, %p1063_p1 }
  0x13   : > { %p614_p13 = pneg %p849_p11 }
  0x15   : > { %p615_p0 = pnand %p614_p13, %p613_p12 }
  0x17   : > { %p616_p3 = pneg %p615_p0 }
  0x19   : > { %p621_p7 = pnand %p619_p5, %p616_p3 }
  0x1b   : > { %624 = shalt.err (!%p621_p7)
}
  0x1c   : > { %s625_s6 = scalar_lea.vmem %s842_s22, 256  ;;  %p633_p2 = scmp.lt.s32.totalorder %s842_s22, %s842_s22 }
  0x1d   : > { %p626_p9 = scmp.ne.s32.totalorder %s842_s22, %s625_s6  ;;  %p634_p12 = scmp.lt.s32.totalorder %s625_s6, %s625_s6 }
  0x1f   : > { %p628_p10 = pnand %p626_p9, %p614_p13  ;;  %p635_p0 = por %p634_p12, %p633_p2 }
  0x21   : > { %p629_p1 = pneg %p628_p10 }
  0x23   : > { %p636_p6 = pnand %p635_p0, %p629_p1 }
  0x25   : > { %639 = shalt.err (!%p636_p6)
}
  0x26   : > { %s772_s7 = smov 128   ;;  %s773_s8 = smov 8  }
  0x27   : > { %556 = dma.hbm_to_vmem [thread:$0]  (!%p849_p11), %s1060_s1, 256, %s842_s22, [#allocation6], %s772_s7, %s772_s7, %s773_s8  }
  0x28   : > { %s640_s21 = scalar_lea.hbm %s1061_s2, 16 }
  0x29   : > { %p641_p1 = scmp.ne.s32.totalorder %s1061_s2, %s640_s21  ;;  %p647_p10 = scmp.lt.u32.totalorder %s640_s21, %s1061_s2 }
  0x2b   : > { %p643_p2 = pnand %p641_p1, %p614_p13 }
  0x2d   : > { %p644_p6 = pneg %p643_p2 }
  0x2f   : > { %p649_p3 = pnand %p647_p10, %p644_p6 }
  0x31   : > { %652 = shalt.err (!%p649_p3)
}
  0x32   : > { %s653_s22 = scalar_lea.vmem %s853_s25, 16  ;;  %s660_s29 = scalar_lea.vmem %s853_s25, 32 }
  0x33   : > { %p654_p5 = scmp.ne.s32.totalorder %s853_s25, %s653_s22  ;;  %p661_p12 = scmp.lt.s32.totalorder %s853_s25, %s853_s25 }
  0x34   : > { %p662_p0 = scmp.lt.s32.totalorder %s660_s29, %s653_s22 }
  0x35   : > { %p656_p7 = pnand %p654_p5, %p614_p13 }
  0x36   : > { %p663_p1 = por %p662_p0, %p661_p12 }
  0x37   : > { %p657_p9 = pneg %p656_p7 }
  0x39   : > { %p664_p2 = pnand %p663_p1, %p657_p9 }
  0x3b   : > { %667 = shalt.err (!%p664_p2)
}
  0x3c   : > { %559 = dma.hbm_to_vmem [thread:$0]  (!%p849_p11), %s1061_s2, 16, %s853_s25, [#allocation6]  }
  0x3d   : > { %s912_s5 = sadd.s32 1, %s768_s15   ;;  %s27_s23 = sadd.s32 1, %s764_s14 }
  0x3e   : > { %s24_s6 = ssub.s32 %s768_s15, %s912_s5  ;;  %p34_p13 = scmp.ne.s32.totalorder %s764_s14, %s760_s13 }
  0x3f   : > { %p25_p6 = scmp.eq.s32.totalorder %s24_s6, 0  ;;  %p35_p10 = scmp.eq.s32.totalorder %s768_s15, 0 }
  0x40   : > { %p1070_p3 = scmp.eq.s32.totalorder %s819_s16, 1  ;;  %p570_p7 = scmp.lt.s32.totalorder %s768_s15, 2 }
  0x41   : > { %s928_s10 = scalar_select %p25_p6, %s764_s14, %s27_s23  }
  0x42   : > { %p922_p5 = por %p1070_p3, %p34_p13  ;;  %p36_p9 = por %p35_p10, %p34_p13 }
  0x43   : > { %s156_s11 = sand.u32 1, %s764_s14   ;;  %s507_s25 = sshll.u32 %s768_s15, 10 }
  0x44   : > { %s1071_s9 = scalar_select %p922_p5, 1, 0 }
  0x45   : > { %s485_s17 = sshll.u32 %s156_s11, 6  ;;  %s935_s26 = scalar_lea.hbm %s1059_s0, %s507_s25 }
  0x46   : > { %s160_s27 = scalar_lea.vmem [#allocation2], %s485_s17  ;;  %p939_p11 = pnand %p570_p7, %p36_p9 }
  0x47   : > { %s167_s28 = sshll.u32 %s160_s27, 4  ;;  %s943_s29 = scalar_lea.sflag [#allocation3], %s156_s11  ;;  %s937_s28 = int_to_ptr.vmem [resolvable:$true] %s167_s28 }
  0x48   : > { %s668_s30 = scalar_lea.hbm %s935_s26, 1024  ;;  %p670_p0 = pneg %p939_p11 }
  0x49   : > { %p669_p12 = scmp.ne.s32.totalorder %s935_s26, %s668_s30  ;;  %s673_s6 = scalar_lea.hbm %s1059_s0, 2048 }
  0x4a   : > { %p674_p13 = scmp.lt.u32.totalorder %s935_s26, %s1059_s0  ;;  %p675_p6 = scmp.lt.u32.totalorder %s673_s6, %s668_s30 }
  0x4b   : > { %p671_p1 = pnand %p670_p0, %p669_p12  ;;  %p677_p3 = scmp.lt.u32.totalorder %s668_s30, %s935_s26 }
  0x4c   : > { %p676_p10 = por %p675_p6, %p674_p13 }
  0x4d   : > { %p672_p2 = pneg %p671_p1 }
  0x4e   : > { %p678_p7 = por %p677_p3, %p676_p10 }
  0x50   : > { %p679_p9 = pnand %p678_p7, %p672_p2 }
  0x52   : > { %682 = shalt.err (!%p679_p9)
}
  0x53   : > { %s683_s11 = scalar_lea.vmem %s937_s28, 1024  ;;  %s774_s21 = smov [#allocation2]  }
  0x54   : > { %p684_p12 = scmp.ne.s32.totalorder %s937_s28, %s683_s11  ;;  %s688_s24 = sshll.u32 %s774_s21, 4  ;;  %s689_s24 = int_to_ptr.vmem [resolvable:$false] %s688_s24 }
  0x55   : > { %s690_s27 = scalar_lea.vmem %s689_s24, 2048  ;;  %p691_p4 = scmp.lt.s32.totalorder %s937_s28, %s689_s24 }
  0x56   : > { %p686_p1 = pnand %p684_p12, %p670_p0  ;;  %p692_p13 = scmp.lt.s32.totalorder %s690_s27, %s683_s11 }
  0x58   : > { %p687_p5 = pneg %p686_p1  ;;  %p693_p6 = por %p692_p13, %p691_p4 }
  0x5a   : > { %p694_p10 = pnand %p693_p6, %p687_p5 }
  0x5c   : > { %697 = shalt.err (!%p694_p10)
}
  0x5d   : > { %563 = dma.hbm_to_vmem [thread:$0]  (!%p939_p11), %s935_s26, 1024, %s937_s28, %s943_s29, %s772_s7, %s772_s7, %s773_s8  }
  0x5e   : > { %179 = sbr.rel (%p838_p8) target bundleno = 347 (0x15b), region = 32  ;;  %s977_s30 = sand.u32 (!%p838_p8), 1, %s760_s13  }
  0x5f   : > { %s489_s4 = sshll.u32 (!%p838_p8), %s977_s30, 6  ;;  %s182_s23 = scalar_lea.sflag (!%p838_p8), [#allocation3], %s977_s30 }
  0x60   : > { %s185_s22 = scalar_lea.vmem (!%p838_p8), [#allocation2], %s489_s4  ;;  %p1073_p4 = scmp.ne.s32.totalorder (!%p838_p8), %s1066_s18, 0 }
  0x65   : > { %743 = dma.done.wait (%p1073_p4), %s182_s23, 1024  }
  0x66   : > { %745 = vsyncadd (%p1073_p4), %s182_s23, 4294966272  ;;  %p1074_p5 = scmp.eq.s32.totalorder %s819_s16, 0 }
  0x68   : > { %747 = dma.done.wait (%p1074_p5), [#allocation6], 272   ;;  %p1075_p8 = pmov %p1074_p5 }
  0x69   : > { %vm235_vm0 = vcmask 130048   ;;  %v226_v0 = vld [vmem:[#allocation5] sm:$0xff]  ;;  %v227_v1 = vld [vmem:[#allocation5 + $0x8] sm:$0xff]  ;;  %v220_v7 = vld [vmem:[%s185_s22 + $0x10] sm:$0xff]  ;;  %vm365_vm1 = vcmask 64512   ;;  %s508_s18 = sshll.u32 %s819_s16, 10 }
  0x6a   : > { %749 = vsyncadd (%p1075_p8), [#allocation6], 4294967024  ;;  %v218_v2 = vld [vmem:[%s185_s22] sm:$0xff]  ;;  %v535_v3 = vpack.c.bf16 %v227_v1, %v226_v0  ;;  %v219_v5 = vld [vmem:[%s185_s22 + $0x8] sm:$0xff]  ;;  %s215_s20 = scalar_lea.vmem [#allocation8], %s489_s4  ;;  %s1009_s26 = scalar_lea.hbm %s1062_s3, %s508_s18 }
  0x6b   : > { %523 = vmatprep.mubr.msk.f32.mxu0 %vm235_vm0, %v218_v2  ;;  %v222_v4 = vld [vmem:[%s185_s22 + $0x20] sm:$0xff]  ;;  %v223_v6 = vld [vmem:[%s185_s22 + $0x28] sm:$0xff]  ;;  %v224_v8 = vld [vmem:[%s185_s22 + $0x30] sm:$0xff]  ;;  %s388_s7 = sshll.u32 %s215_s20, 4  ;;  %s375_s28 = scalar_lea.sflag [#allocation4], %s977_s30  ;;  %s1011_s7 = int_to_ptr.vmem [resolvable:$true] %s388_s7 }
  0x6c   : > { %529 = vmatprep.mubr.msk.f32.mxu1 %vm235_vm0, %v222_v4  ;;  %536 = vmatprep.subr.bf16.mxu0 %v535_v3  ;;  %v221_v9 = vld [vmem:[%s185_s22 + $0x18] sm:$0xff]  ;;  %v493_v11 = vld [vmem:[#allocation7] ss:$0 sm:$0xff]  ;;  %s698_s29 = scalar_lea.vmem %s1011_s7, 1024  ;;  %p1076_p0 = scmp.ne.s32.totalorder %s1071_s9, 0 }
  0x6d   : > { %539 = vmatprep.subr.bf16.mxu1 %v535_v3  ;;  %538 = vmatpush3.bf16.msra.mxu0 %v535_v3  ;;  %v225_v10 = vld [vmem:[%s185_s22 + $0x38] sm:$0xff]  ;;  %p699_p11 = scmp.ne.s32.totalorder %s1011_s7, %s698_s29  ;;  %s775_s6 = smov [#allocation8]  }
  0x6e   : > { %540 = vmatpush3.bf16.msra.mxu1 %v535_v3  ;;  %s702_s17 = sshll.u32 %s775_s6, 4  ;;  %s703_s17 = int_to_ptr.vmem [resolvable:$false] %s702_s17 }
  0x6f   : > { %p700_p2 = pnand %p699_p11, %p1076_p0  ;;  %s704_s25 = scalar_lea.vmem %s703_s17, 2048 }
  0x70   : > { %524 = vmatmul.mubr.msk.f32.vlgmr.msra.gmra.mrb[0].mxu0 %vm235_vm0, %v219_v5  ;;  %p705_p7 = scmp.lt.s32.totalorder %s1011_s7, %s703_s17  ;;  %p706_p9 = scmp.lt.s32.totalorder %s704_s25, %s698_s29 }
  0x71   : > { %530 = vmatmul.mubr.msk.f32.vlgmr.msra.gmra.mrb[0].mxu1 %vm235_vm0, %v223_v6  ;;  %526 = vmatprep.mubr.msk.f32.mxu0 %vm235_vm0, %v220_v7  ;;  %p701_p3 = pneg %p700_p2 }
  0x72   : > { %532 = vmatprep.mubr.msk.f32.mxu1 %vm235_vm0, %v224_v8  ;;  %p707_p12 = por %p706_p9, %p705_p7 }
  0x74   : > { %527 = vmatmul.mubr.msk.f32.gmra.mrb[2].mxu0 %vm235_vm0, %v221_v9  ;;  %p708_p1 = pnand %p707_p12, %p701_p3 }
  0x75   : > { %533 = vmatmul.mubr.msk.f32.gmra.mrb[2].mxu1 %vm235_vm0, %v225_v10 }
 0x143   : > { %v525_v12 = vpop.f32.mrb[0].mxu0 }
 0x144   : > { %v531_v13 = vpop.f32.mrb[0].mxu1  ;;  %v332_v14 = vadd.f32 %v525_v12, %v493_v11  ;;  %v326_v16 = vpop.f32.mrb[1].mxu0 }
 0x145   : > { %v352_v15 = vadd.f32 %v531_v13, %v493_v11  ;;  %v346_v17 = vpop.f32.mrb[1].mxu1  ;;  %v327_v18 = vadd.f32 %v493_v11, %v326_v16 }
 0x146   : > { %v347_v19 = vadd.f32 %v493_v11, %v346_v17  ;;  %367 = vst.msk [vmem:[%s215_s20 + $0x8] sm:$0xff] %vm365_vm1, %v332_v14 }
 0x147   : > { %371 = vst.msk [vmem:[%s215_s20 + $0x28] sm:$0xff] %vm365_vm1, %v352_v15  ;;  %366 = vst.msk [vmem:[%s215_s20] sm:$0xff] %vm365_vm1, %v327_v18  ;;  %v528_v20 = vpop.f32.mrb[2].mxu0 }
 0x148   : > { %370 = vst.msk [vmem:[%s215_s20 + $0x20] sm:$0xff] %vm365_vm1, %v347_v19  ;;  %v534_v21 = vpop.f32.mrb[2].mxu1  ;;  %v342_v22 = vadd.f32 %v528_v20, %v493_v11  ;;  %v336_v24 = vpop.f32.mrb[3].mxu0 }
 0x149   : > { %v362_v23 = vadd.f32 %v534_v21, %v493_v11  ;;  %v356_v25 = vpop.f32.mrb[3].mxu1  ;;  %v337_v26 = vadd.f32 %v493_v11, %v336_v24 }
 0x14a   : > { %v357_v27 = vadd.f32 %v493_v11, %v356_v25  ;;  %369 = vst.msk [vmem:[%s215_s20 + $0x18] sm:$0xff] %vm365_vm1, %v342_v22 }
 0x14b   : > { %373 = vst.msk [vmem:[%s215_s20 + $0x38] sm:$0xff] %vm365_vm1, %v362_v23  ;;  %368 = vst.msk [vmem:[%s215_s20 + $0x10] sm:$0xff] %vm365_vm1, %v337_v26 }
 0x14c   : > { %372 = vst.msk [vmem:[%s215_s20 + $0x30] sm:$0xff] %vm365_vm1, %v357_v27 }
 0x14d   : > { %711 = shalt.err (!%p708_p1)
}
 0x14e   : > { %s712_s11 = scalar_lea.hbm %s1009_s26, 1024  ;;  %s716_s27 = scalar_lea.hbm %s1062_s3, 2048 }
 0x14f   : > { %p713_p13 = scmp.ne.s32.totalorder %s1009_s26, %s712_s11  ;;  %p717_p4 = scmp.lt.u32.totalorder %s1009_s26, %s1062_s3 }
 0x150   : > { %p718_p5 = scmp.lt.u32.totalorder %s716_s27, %s712_s11  ;;  %p720_p11 = scmp.lt.u32.totalorder %s712_s11, %s1009_s26 }
 0x151   : > { %p714_p6 = pnand %p713_p13, %p1076_p0 }
 0x152   : > { %p719_p8 = por %p718_p5, %p717_p4 }
 0x153   : > { %p715_p10 = pneg %p714_p6 }
 0x154   : > { %p721_p2 = por %p720_p11, %p719_p8 }
 0x156   : > { %p722_p3 = pnand %p721_p2, %p715_p10 }
 0x158   : > { %725 = shalt.err (!%p722_p3)
}
 0x159   : > { %s776_s22 = smov 128   ;;  %s777_s18 = smov 8  }
 0x15a   : > { %551 = dma.vmem_to_hbm [thread:$0]  (%p1076_p0), %s1011_s7, 1024, %s1009_s26, %s375_s28, %s776_s22, %s776_s22, %s777_s18  }
 0x15b PF: > { %s403_s20 = sand.u32 1, %s756_s12   ;;  %p1077_p7 = scmp.ne.s32.totalorder %s1067_s19, 0 }
 0x15c   : > { %p1078_p9 = scmp.ge.s32.totalorder %s768_s15, 2  ;;  %s404_s16 = scalar_lea.sflag [#allocation4], %s403_s20 }
 0x15e   : > { %p565_p12 = pnand %p1078_p9, %p1077_p7 }
 0x160   : > { %751 = dma.done.wait (!%p565_p12), %s404_s16, 1024  }
 0x161   : > { %753 = vsyncadd (!%p565_p12), %s404_s16, 4294966272  ;;  %p17_p1 = scmp.ge.s32.totalorder %s912_s5, 4   ;;  %s1079_s12 = smov %s760_s13 }
 0x162   : > { %s1080_s13 = smov %s764_s14  ;;  %s1081_s14 = smov %s928_s10 }
 0x163   : > { %s1082_s15 = smov %s912_s5  ;;  %19 = sbr.rel (!%p17_p1) target bundleno = 6 (0x6), region = 85 }
 0x16a   :  { %409 = vsyncpa [#allocation3], 1 }
 0x16b   :  { %411 = vsyncpa [#allocation3 + $0x1], 1 }
 0x16c   :  { %412 = vsyncpa [#allocation6], 1 }
 0x16d   :  { %413 = vsyncpa [#allocation4], 1 }
 0x16e   :  { %415 = vsyncpa [#allocation4 + $0x1], 1 }

// kernel: multi_attention_block.5
= control target key start
LH: loop header
LB: loop body
LE: loop exit
PB: predicated region body
PF: predicated region fallthrough
CT: control target
= control target key end

     0   :  { %s1454_s0 = inlined_call_operand.hbm [shape: bf16[8,1024], index: 0, kind: input, shape index: {}]   ;;  %s1455_s1 = inlined_call_operand.hbm [shape: bf16[1024,128], index: 1, kind: input, shape index: {}]   ;;  %s1456_s2 = inlined_call_operand.hbm [shape: f32[8,128], index: 2, kind: input, shape index: {}]   ;;  %s1457_s3 = inlined_call_operand.hbm [shape: f32[128,16], index: 3, kind: input, shape index: {}]   ;;  %s1458_s4 = inlined_call_operand.<no memory space> [shape: f32[1,1], index: 4, kind: input, shape index: {}]   ;;  %s1459_s5 = inlined_call_operand.hbm [shape: f32[8,16], index: 5, kind: output, shape index: {}]  }
   0x1   :  { %v10_v0 = vstv %s1458_s4 }
   0x2   :  { %11 = vst [vmem:[#allocation2] sm:$0x1] %v10_v0 }
   0x3   :  { %12 = vsyncpa [#allocation4], 0 }
   0x4   :  { %13 = vsyncpa [#allocation7], 0 }
   0x5   :  { %14 = vsyncpa [#allocation10], 0 }
   0x6   :  { %15 = vsyncpa [#allocation5], 0  ;;  %s1348_s20 = smov [#allocation6]   ;;  %s1230_s24 = scalar_lea.hbm %s1455_s1, 8192 }
   0x7   :  { %s31_s21 = sshll.u32 %s1348_s20, 4  ;;  %p1231_p0 = scmp.ne.s32.totalorder %s1455_s1, %s1230_s24  ;;  %s32_s21 = int_to_ptr.vmem [resolvable:$true] %s31_s21 }
   0x8   :  { %p1234_p1 = scmp.lt.u32.totalorder %s1230_s24, %s1455_s1 }
   0xa   :  { %p1236_p2 = pnand %p1234_p1, %p1231_p0 }
   0xc   :  { %1239 = shalt.err (!%p1236_p2)
}
   0xd   :  { %s1240_s4 = scalar_lea.vmem %s32_s21, 8192  ;;  %p1245_p4 = scmp.lt.s32.totalorder %s32_s21, %s32_s21 }
   0xe   :  { %p1241_p3 = scmp.ne.s32.totalorder %s32_s21, %s1240_s4  ;;  %p1246_p5 = scmp.lt.s32.totalorder %s1240_s4, %s1240_s4 }
  0x10   :  { %p1247_p6 = por %p1246_p5, %p1245_p4 }
  0x12   :  { %p1248_p7 = pnand %p1247_p6, %p1241_p3 }
  0x14   :  { %1251 = shalt.err (!%p1248_p7)
}
  0x15   :  { %s1349_s29 = smov 64   ;;  %s1350_s30 = smov 4  }
  0x16   :  { %37 = dma.hbm_to_vmem [thread:$0]  %s1455_s1, 8192, %s32_s21, [#allocation7], %s1349_s29, %s1349_s29, %s1350_s30  }
  0x17   :  { %s1351_s8 = smov [#allocation3]   ;;  %s1352_s10 = smov [#allocation8]  }
  0x18   :  { %s22_s9 = sshll.u32 %s1351_s8, 4  ;;  %s44_s11 = sshll.u32 %s1352_s10, 4  ;;  %s23_s9 = int_to_ptr.vmem [resolvable:$true] %s22_s9  ;;  %s45_s11 = int_to_ptr.vmem [resolvable:$true] %s44_s11 }
  0x19   :  { %s1252_s14 = scalar_lea.hbm %s1454_s0, 512 }
  0x1a   :  { %p1253_p8 = scmp.ne.s32.totalorder %s1454_s0, %s1252_s14  ;;  %p1256_p9 = scmp.lt.u32.totalorder %s1252_s14, %s1454_s0 }
  0x1c   :  { %p1258_p10 = pnand %p1256_p9, %p1253_p8 }
  0x1e   :  { %1261 = shalt.err (!%p1258_p10)
}
  0x1f   :  { %s1262_s1 = scalar_lea.vmem %s23_s9, 512  ;;  %p1267_p12 = scmp.lt.s32.totalorder %s23_s9, %s23_s9 }
  0x20   :  { %p1263_p11 = scmp.ne.s32.totalorder %s23_s9, %s1262_s1  ;;  %p1268_p13 = scmp.lt.s32.totalorder %s1262_s1, %s1262_s1 }
  0x22   :  { %p1269_p0 = por %p1268_p13, %p1267_p12 }
  0x24   :  { %p1270_p1 = pnand %p1269_p0, %p1263_p11 }
  0x26   :  { %1273 = shalt.err (!%p1270_p1)
}
  0x27   :  { %25 = dma.hbm_to_vmem [thread:$0]  %s1454_s0, 512, %s23_s9, [#allocation4]  }
  0x28   :  { %s1274_s23 = scalar_lea.hbm %s1456_s2, 128 }
  0x29   :  { %p1275_p2 = scmp.ne.s32.totalorder %s1456_s2, %s1274_s23  ;;  %p1278_p3 = scmp.lt.u32.totalorder %s1274_s23, %s1456_s2 }
  0x2b   :  { %p1280_p4 = pnand %p1278_p3, %p1275_p2 }
  0x2d   :  { %1283 = shalt.err (!%p1280_p4)
}
  0x2e   :  { %s1284_s28 = scalar_lea.vmem %s45_s11, 128  ;;  %p1289_p6 = scmp.lt.s32.totalorder %s45_s11, %s45_s11 }
  0x2f   :  { %p1285_p5 = scmp.ne.s32.totalorder %s45_s11, %s1284_s28  ;;  %p1290_p7 = scmp.lt.s32.totalorder %s1284_s28, %s1284_s28 }
  0x31   :  { %p1291_p8 = por %p1290_p7, %p1289_p6 }
  0x33   :  { %p1292_p9 = pnand %p1291_p8, %p1285_p5 }
  0x35   :  { %1295 = shalt.err (!%p1292_p9)
}
  0x36   :  { %47 = dma.hbm_to_vmem [thread:$0]  %s1456_s2, 128, %s45_s11, [#allocation7]  }
  0x37   :  { %s1353_s29 = smov [#allocation9]   ;;  %s1296_s8 = scalar_lea.hbm %s1457_s3, 2048 }
  0x38   :  { %s53_s30 = sshll.u32 %s1353_s29, 4  ;;  %p1297_p10 = scmp.ne.s32.totalorder %s1457_s3, %s1296_s8  ;;  %s54_s30 = int_to_ptr.vmem [resolvable:$true] %s53_s30 }
  0x39   :  { %p1300_p11 = scmp.lt.u32.totalorder %s1296_s8, %s1457_s3 }
  0x3b   :  { %p1302_p12 = pnand %p1300_p11, %p1297_p10 }
  0x3d   :  { %1305 = shalt.err (!%p1302_p12)
}
  0x3e   :  { %s1306_s14 = scalar_lea.vmem %s54_s30, 2048  ;;  %p1311_p0 = scmp.lt.s32.totalorder %s54_s30, %s54_s30 }
  0x3f   :  { %p1307_p13 = scmp.ne.s32.totalorder %s54_s30, %s1306_s14  ;;  %p1312_p1 = scmp.lt.s32.totalorder %s1306_s14, %s1306_s14 }
  0x41   :  { %p1313_p2 = por %p1312_p1, %p1311_p0 }
  0x43   :  { %p1314_p3 = pnand %p1313_p2, %p1307_p13 }
  0x45   :  { %1317 = shalt.err (!%p1314_p3)
}
  0x46   :  { %s1354_s2 = smov 128   ;;  %s1355_s11 = smov 8  }
  0x47   :  { %59 = dma.hbm_to_vmem [thread:$0]  %s1457_s3, 2048, %s54_s30, [#allocation10], %s1354_s2, %s1354_s2, %s1355_s11  }
  0x48   :  { %1340 = dma.done.wait [#allocation4], 512  }
  0x49   :  { %1341 = vsyncadd [#allocation4], 4294966784 }
  0x4a   :  { %1342 = dma.done.wait [#allocation7], 8320  }
  0x4b   :  { %1343 = vsyncadd [#allocation7], 4294958976 }
  0x4c   :  { %1344 = dma.done.wait [#allocation10], 2048  }
  0x4d   :  { %1345 = vsyncadd [#allocation10], 4294965248  ;;  %v1154_v1 = vld [vmem:[#allocation6 + $0x40] sm:$0xff]   ;;  %v1158_v5 = vld [vmem:[#allocation6 + $0x48] sm:$0xff]   ;;  %vm1357_vm0 = vmmov 0   ;;  %s1360_s3 = smov [#allocation11]  }
  0x4e   :  { %v1155_v2 = vld [vmem:[#allocation6 + $0xc0] sm:$0xff]   ;;  %976 = vmatprep.subr.bf16.mxu0 %v1154_v1  ;;  %v1159_v6 = vld [vmem:[#allocation6 + $0xc8] sm:$0xff]   ;;  %v1162_v9 = vld [vmem:[#allocation6 + $0x50] sm:$0xff]   ;;  %s891_s17 = sshll.u32 %s1360_s3, 4  ;;  %vm883_vm1 = vcmask 130048   ;;  %s892_s17 = int_to_ptr.vmem [resolvable:$true] %s891_s17 }
  0x4f   :  { %v1156_v3 = vld [vmem:[#allocation6] sm:$0xff]   ;;  %998 = vmatprep.subr.bf16.mxu1 %v1155_v2  ;;  %v1160_v7 = vld [vmem:[#allocation6 + $0x8] sm:$0xff]   ;;  %v1163_v10 = vld [vmem:[#allocation6 + $0xd0] sm:$0xff]   ;;  %s1318_s18 = scalar_lea.vmem %s892_s17, 128  ;;  %p1323_p5 = scmp.lt.s32.totalorder %s892_s17, %s892_s17 }
  0x50   :  { %v1157_v4 = vld [vmem:[#allocation6 + $0x80] sm:$0xff]   ;;  %977 = vmatpush3.bf16.msra.mxu0 %v1156_v3  ;;  %v1161_v8 = vld [vmem:[#allocation6 + $0x88] sm:$0xff]   ;;  %v1164_v11 = vld [vmem:[#allocation6 + $0x10] sm:$0xff]   ;;  %p1319_p4 = scmp.ne.s32.totalorder %s892_s17, %s1318_s18  ;;  %p1324_p6 = scmp.lt.s32.totalorder %s1318_s18, %s1318_s18 }
  0x51   :  { %999 = vmatpush3.bf16.msra.mxu1 %v1157_v4  ;;  %978 = vmatprep.subr.bf16.mxu0 %v1158_v5  ;;  %v1165_v12 = vld [vmem:[#allocation6 + $0x90] sm:$0xff]   ;;  %v1166_v13 = vld [vmem:[#allocation6 + $0x58] sm:$0xff]   ;;  %v1170_v17 = vld [vmem:[#allocation6 + $0x60] sm:$0xff]  }
  0x52   :  { %1000 = vmatprep.subr.bf16.mxu1 %v1159_v6  ;;  %v1167_v14 = vld [vmem:[#allocation6 + $0xd8] sm:$0xff]   ;;  %v1171_v18 = vld [vmem:[#allocation6 + $0xe0] sm:$0xff]   ;;  %v1174_v21 = vld [vmem:[#allocation6 + $0x68] sm:$0xff]   ;;  %p1325_p7 = por %p1324_p6, %p1323_p5 }
  0x53   :  { %v1168_v15 = vld [vmem:[#allocation6 + $0x18] sm:$0xff]   ;;  %v1172_v19 = vld [vmem:[#allocation6 + $0x20] sm:$0xff]   ;;  %v1175_v22 = vld [vmem:[#allocation6 + $0xe8] sm:$0xff]  }
  0x54   :  { %979 = vmatpush3.bf16.msra.mxu0 %v1160_v7  ;;  %v1169_v16 = vld [vmem:[#allocation6 + $0x98] sm:$0xff]   ;;  %v1173_v20 = vld [vmem:[#allocation6 + $0xa0] sm:$0xff]   ;;  %v1176_v23 = vld [vmem:[#allocation6 + $0x28] sm:$0xff]   ;;  %p1326_p8 = pnand %p1325_p7, %p1319_p4 }
  0x55   :  { %1001 = vmatpush3.bf16.msra.mxu1 %v1161_v8  ;;  %980 = vmatprep.subr.bf16.mxu0 %v1162_v9  ;;  %v1177_v24 = vld [vmem:[#allocation6 + $0xa8] sm:$0xff]   ;;  %v1178_v25 = vld [vmem:[#allocation6 + $0x70] sm:$0xff]   ;;  %v1182_v29 = vld [vmem:[#allocation6 + $0x78] sm:$0xff]  }
  0x56   :  { %1002 = vmatprep.subr.bf16.mxu1 %v1163_v10  ;;  %v1179_v26 = vld [vmem:[#allocation6 + $0xf0] sm:$0xff]   ;;  %v1183_v30 = vld [vmem:[#allocation6 + $0xf8] sm:$0xff]   ;;  %v75_v33 = vld [vmem:[#allocation3] sm:$0xff] }
  0x57   :  { %v1180_v27 = vld [vmem:[#allocation6 + $0x30] sm:$0xff]   ;;  %v1184_v31 = vld [vmem:[#allocation6 + $0x38] sm:$0xff]   ;;  %v76_v34 = vld [vmem:[#allocation3 + $0x8] sm:$0xff]  ;;  %v902_v35 = vcombine.low %v75_v33, %v75_v33  ;;  %v903_v36 = vcombine.high %v75_v33, %v75_v33 }
  0x58   :  { %981 = vmatpush3.bf16.msra.mxu0 %v1164_v11  ;;  %v1181_v28 = vld [vmem:[#allocation6 + $0xb0] sm:$0xff]   ;;  %v1185_v32 = vld [vmem:[#allocation6 + $0xb8] sm:$0xff]   ;;  %v904_v37 = vcombine.low %v76_v34, %v76_v34  ;;  %v905_v38 = vcombine.high %v76_v34, %v76_v34  ;;  %v1190_v39 = vld [vmem:[#allocation6 + $0x140] sm:$0xff]  }
  0x59   :  { %1003 = vmatpush3.bf16.msra.mxu1 %v1165_v12  ;;  %982 = vmatprep.subr.bf16.mxu0 %v1166_v13  ;;  %v1191_v40 = vld [vmem:[#allocation6 + $0x1c0] sm:$0xff]   ;;  %v1194_v43 = vld [vmem:[#allocation6 + $0x148] sm:$0xff]   ;;  %v1198_v47 = vld [vmem:[#allocation6 + $0x150] sm:$0xff]  }
  0x5a   :  { %1004 = vmatprep.subr.bf16.mxu1 %v1167_v14  ;;  %652 = vmatprep.mubr.bf16.mxu0 %v903_v36  ;;  %v1192_v41 = vld [vmem:[#allocation6 + $0x100] sm:$0xff]   ;;  %v1195_v44 = vld [vmem:[#allocation6 + $0x1c8] sm:$0xff]   ;;  %v1199_v48 = vld [vmem:[#allocation6 + $0x1d0] sm:$0xff]  }
  0x5b   :  { %692 = vmatprep.mubr.bf16.mxu1 %v905_v38  ;;  %v1193_v42 = vld [vmem:[#allocation6 + $0x180] sm:$0xff]   ;;  %v1196_v45 = vld [vmem:[#allocation6 + $0x108] sm:$0xff]   ;;  %v1200_v49 = vld [vmem:[#allocation6 + $0x110] sm:$0xff]   ;;  %v1358_v38 = vmov 0.0  }
  0x5c   :  { %983 = vmatpush3.bf16.msra.mxu0 %v1168_v15  ;;  %v1197_v46 = vld [vmem:[#allocation6 + $0x188] sm:$0xff]   ;;  %v1201_v50 = vld [vmem:[#allocation6 + $0x190] sm:$0xff]   ;;  %v1202_v51 = vld [vmem:[#allocation6 + $0x158] sm:$0xff]  }
  0x5d   :  { %1005 = vmatpush3.bf16.msra.mxu1 %v1169_v16  ;;  %984 = vmatprep.subr.bf16.mxu0 %v1170_v17  ;;  %v1203_v52 = vld [vmem:[#allocation6 + $0x1d8] sm:$0xff]   ;;  %v1206_v55 = vld [vmem:[#allocation6 + $0x160] sm:$0xff]   ;;  %v1210_v59 = vld [vmem:[#allocation6 + $0x168] sm:$0xff]   ;;  %v1356_v16 = vmov 0.0|0.0  }
  0x5e   :  { %1006 = vmatprep.subr.bf16.mxu1 %v1171_v18  ;;  %v1204_v53 = vld [vmem:[#allocation6 + $0x118] sm:$0xff]   ;;  %v1207_v56 = vld [vmem:[#allocation6 + $0x1e0] sm:$0xff]   ;;  %v1211_v60 = vld [vmem:[#allocation6 + $0x1e8] sm:$0xff]  }
  0x5f   :  { %v1205_v54 = vld [vmem:[#allocation6 + $0x198] sm:$0xff]   ;;  %v1208_v57 = vld [vmem:[#allocation6 + $0x120] sm:$0xff]   ;;  %v1212_v61 = vld [vmem:[#allocation6 + $0x128] sm:$0xff]  }
  0x60   :  { %985 = vmatpush3.bf16.msra.mxu0 %v1172_v19  ;;  %v1209_v58 = vld [vmem:[#allocation6 + $0x1a0] sm:$0xff]   ;;  %v1213_v62 = vld [vmem:[#allocation6 + $0x1a8] sm:$0xff]   ;;  %v1214_v63 = vld [vmem:[#allocation6 + $0x170] sm:$0xff]  }
  0x61   :  { %1007 = vmatpush3.bf16.msra.mxu1 %v1173_v20  ;;  %986 = vmatprep.subr.bf16.mxu0 %v1174_v21  ;;  %v1215_v0 = vld [vmem:[#allocation6 + $0x1f0] sm:$0xff]   ;;  %v1218_v3 = vld [vmem:[#allocation6 + $0x178] sm:$0xff]   ;;  %v781_v13 = vld [vmem:[#allocation9] sm:$0xff] }
  0x62   :  { %1008 = vmatprep.subr.bf16.mxu1 %v1175_v22  ;;  %v1216_v1 = vld [vmem:[#allocation6 + $0x130] sm:$0xff]   ;;  %v1219_v4 = vld [vmem:[#allocation6 + $0x1f8] sm:$0xff]   ;;  %v784_v18 = vld [vmem:[#allocation9 + $0x18] sm:$0xff] }
  0x63   :  { %v1217_v2 = vld [vmem:[#allocation6 + $0x1b0] sm:$0xff]   ;;  %v1220_v5 = vld [vmem:[#allocation6 + $0x138] sm:$0xff]   ;;  %v785_v20 = vld [vmem:[#allocation9 + $0x20] sm:$0xff] }
  0x64   :  { %987 = vmatpush3.bf16.msra.mxu0 %v1176_v23  ;;  %v1221_v6 = vld [vmem:[#allocation6 + $0x1b8] sm:$0xff]   ;;  %v77_v7 = vld [vmem:[#allocation3 + $0x10] sm:$0xff]  ;;  %v796_v36 = vld [vmem:[#allocation9 + $0x78] sm:$0xff] }
  0x65   :  { %1009 = vmatpush3.bf16.msra.mxu1 %v1177_v24  ;;  %988 = vmatprep.subr.bf16.mxu0 %v1178_v25  ;;  %v906_v8 = vcombine.low %v77_v7, %v77_v7  ;;  %v907_v9 = vcombine.high %v77_v7, %v77_v7  ;;  %v78_v10 = vld [vmem:[#allocation3 + $0x18] sm:$0xff]  ;;  %v782_v14 = vld [vmem:[#allocation9 + $0x8] sm:$0xff]  ;;  %v788_v24 = vld [vmem:[#allocation9 + $0x38] sm:$0xff] }
  0x66   :  { %1010 = vmatprep.subr.bf16.mxu1 %v1179_v26  ;;  %v908_v11 = vcombine.low %v78_v10, %v78_v10  ;;  %v909_v12 = vcombine.high %v78_v10, %v78_v10  ;;  %v783_v15 = vld [vmem:[#allocation9 + $0x10] sm:$0xff]  ;;  %v1117_v17 = vpack.c.bf16 %v782_v14, %v781_v13  ;;  %v786_v21 = vld [vmem:[#allocation9 + $0x28] sm:$0xff]  ;;  %v789_v26 = vld [vmem:[#allocation9 + $0x40] sm:$0xff] }
  0x67   :  { %v1120_v19 = vpack.c.bf16 %v784_v18, %v783_v15  ;;  %v1123_v22 = vpack.c.bf16 %v786_v21, %v785_v20  ;;  %v787_v23 = vld [vmem:[#allocation9 + $0x30] sm:$0xff]  ;;  %v794_v33 = vld [vmem:[#allocation9 + $0x68] sm:$0xff] }
  0x68   :  { %989 = vmatpush3.bf16.msra.mxu0 %v1180_v27  ;;  %v1126_v25 = vpack.c.bf16 %v788_v24, %v787_v23  ;;  %v790_v27 = vld [vmem:[#allocation9 + $0x48] sm:$0xff] }
  0x69   :  { %1011 = vmatpush3.bf16.msra.mxu1 %v1181_v28  ;;  %990 = vmatprep.subr.bf16.mxu0 %v1182_v29  ;;  %v1129_v28 = vpack.c.bf16 %v790_v27, %v789_v26  ;;  %v791_v29 = vld [vmem:[#allocation9 + $0x50] sm:$0xff] }
  0x6a   :  { %1012 = vmatprep.subr.bf16.mxu1 %v1183_v30  ;;  %v792_v30 = vld [vmem:[#allocation9 + $0x58] sm:$0xff] }
  0x6c   :  { %991 = vmatpush3.bf16.msra.mxu0 %v1184_v31  ;;  %v1132_v31 = vpack.c.bf16 %v792_v30, %v791_v29 }
  0x6d   :  { %1013 = vmatpush3.bf16.msra.mxu1 %v1185_v32  ;;  %1020 = vmatprep.subr.bf16.mxu0 %v1190_v39  ;;  %v793_v32 = vld [vmem:[#allocation9 + $0x60] sm:$0xff]  ;;  %v974_v39 = vld [vmem:[#allocation2] ss:$0 sm:$0xff] }
  0x6e   :  { %1042 = vmatprep.subr.bf16.mxu1 %v1191_v40  ;;  %v1135_v34 = vpack.c.bf16 %v794_v33, %v793_v32  ;;  %v1359_v40 = vmov 0  }
  0x6f   :  { %653 = vmatmul.mubr.bf16.vlgmr.msra.gmra.mrb[0].mxu0 %v902_v35  ;;  %v795_v35 = vld [vmem:[#allocation9 + $0x70] sm:$0xff]  ;;  %1153 = vset.pattern.permute.xlu0 %v1359_v40 }
  0x70   :  { %693 = vmatmul.mubr.bf16.vlgmr.msra.gmra.mrb[0].mxu1 %v904_v37  ;;  %1021 = vmatpush3.bf16.msra.mxu0 %v1192_v41  ;;  %v1138_v37 = vpack.c.bf16 %v796_v36, %v795_v35 }
  0x71   :  { %1043 = vmatpush3.bf16.msra.mxu1 %v1193_v42  ;;  %1022 = vmatprep.subr.bf16.mxu0 %v1194_v43  ;;  %v207_v43 = vld [vmem:[#allocation8] sm:$0xff] }
  0x72   :  { %1044 = vmatprep.subr.bf16.mxu1 %v1195_v44  ;;  %732 = vmatprep.mubr.bf16.mxu0 %v907_v9 }
  0x73   :  { %772 = vmatprep.mubr.bf16.mxu1 %v909_v12  ;;  %804 = vperm.xlu0 %1153, %v974_v39  }
  0x74   :  { %1023 = vmatpush3.bf16.msra.mxu0 %v1196_v45 }
  0x75   :  { %1045 = vmatpush3.bf16.msra.mxu1 %v1197_v46  ;;  %1024 = vmatprep.subr.bf16.mxu0 %v1198_v47 }
  0x76   :  { %1046 = vmatprep.subr.bf16.mxu1 %v1199_v48 }
  0x78   :  { %1025 = vmatpush3.bf16.msra.mxu0 %v1200_v49 }
  0x79   :  { %1047 = vmatpush3.bf16.msra.mxu1 %v1201_v50  ;;  %1026 = vmatprep.subr.bf16.mxu0 %v1202_v51 }
  0x7a   :  { %1048 = vmatprep.subr.bf16.mxu1 %v1203_v52 }
  0x7c   :  { %1027 = vmatpush3.bf16.msra.mxu0 %v1204_v53 }
  0x7d   :  { %1049 = vmatpush3.bf16.msra.mxu1 %v1205_v54  ;;  %1028 = vmatprep.subr.bf16.mxu0 %v1206_v55 }
  0x7e   :  { %1050 = vmatprep.subr.bf16.mxu1 %v1207_v56 }
  0x80   :  { %1029 = vmatpush3.bf16.msra.mxu0 %v1208_v57 }
  0x81   :  { %1051 = vmatpush3.bf16.msra.mxu1 %v1209_v58  ;;  %1030 = vmatprep.subr.bf16.mxu0 %v1210_v59 }
  0x82   :  { %1052 = vmatprep.subr.bf16.mxu1 %v1211_v60 }
  0x84   :  { %1031 = vmatpush3.bf16.msra.mxu0 %v1212_v61 }
  0x85   :  { %1053 = vmatpush3.bf16.msra.mxu1 %v1213_v62  ;;  %1032 = vmatprep.subr.bf16.mxu0 %v1214_v63 }
  0x86   :  { %1054 = vmatprep.subr.bf16.mxu1 %v1215_v0 }
  0x88   :  { %1033 = vmatpush3.bf16.msra.mxu0 %v1216_v1 }
  0x89   :  { %1055 = vmatpush3.bf16.msra.mxu1 %v1217_v2  ;;  %1034 = vmatprep.subr.bf16.mxu0 %v1218_v3 }
  0x8a   :  { %1056 = vmatprep.subr.bf16.mxu1 %v1219_v4 }
  0x8c   :  { %1035 = vmatpush3.bf16.msra.mxu0 %v1220_v5 }
  0x8d   :  { %1057 = vmatpush3.bf16.msra.mxu1 %v1221_v6  ;;  %1116 = vmatprep.subr.bf16.mxu0 %v1356_v16 }
  0x8f   :  { %733 = vmatmul.mubr.bf16.vlgmr.msra.gmra.mrb[4].mxu0 %v906_v8 }
  0x90   :  { %773 = vmatmul.mubr.bf16.vlgmr.msra.gmra.mrb[4].mxu1 %v908_v11  ;;  %1118 = vmatpush3.bf16.msra.mxu0 %v1117_v17 }
  0x91   :  { %1119 = vmatprep.subr.bf16.mxu0 %v1356_v16  ;;  %1113 = vmatprep.mubr.msk.f32.mxu0 %vm1357_vm0, %v1358_v38 }
  0x94   :  { %1121 = vmatpush3.bf16.msra.mxu0 %v1120_v19 }
  0x95   :  { %1122 = vmatprep.subr.bf16.mxu0 %v1356_v16 }
  0x98   :  { %1124 = vmatpush3.bf16.msra.mxu0 %v1123_v22 }
  0x99   :  { %1125 = vmatprep.subr.bf16.mxu0 %v1356_v16 }
  0x9c   :  { %1127 = vmatpush3.bf16.msra.mxu0 %v1126_v25 }
  0x9d   :  { %1128 = vmatprep.subr.bf16.mxu0 %v1356_v16 }
  0xa0   :  { %1130 = vmatpush3.bf16.msra.mxu0 %v1129_v28 }
  0xa1   :  { %1131 = vmatprep.subr.bf16.mxu0 %v1356_v16 }
  0xa4   :  { %1133 = vmatpush3.bf16.msra.mxu0 %v1132_v31 }
  0xa5   :  { %1134 = vmatprep.subr.bf16.mxu0 %v1356_v16 }
  0xa8   :  { %1136 = vmatpush3.bf16.msra.mxu0 %v1135_v34 }
  0xa9   :  { %1137 = vmatprep.subr.bf16.mxu0 %v1356_v16 }
  0xac   :  { %1139 = vmatpush3.bf16.msra.mxu0 %v1138_v37 }
  0xf2   :  { %v805_v3 = vpop.permute.xlu0 %804 }
 0x142   :  { %v992_v41 = vpop.f32.mrb[0].mxu0 }
 0x143   :  { %v1014_v42 = vpop.f32.mrb[0].mxu1  ;;  %v993_v44 = vpop.f32.mrb[1].mxu0 }
 0x144   :  { %v1015_v45 = vpop.f32.mrb[1].mxu1  ;;  %v994_v46 = vadd.f32 %v993_v44, %v992_v41  ;;  %v995_v48 = vpop.f32.mrb[2].mxu0 }
 0x145   :  { %v1016_v47 = vadd.f32 %v1015_v45, %v1014_v42  ;;  %v1017_v49 = vpop.f32.mrb[2].mxu1  ;;  %v996_v50 = vpop.f32.mrb[3].mxu0 }
 0x146   :  { %v1018_v51 = vpop.f32.mrb[3].mxu1  ;;  %v655_v52 = vadd.f32 %v994_v46, %v207_v43 }
 0x148   :  { %v695_v53 = vadd.f32 %v1016_v47, %v655_v52 }
 0x162   :  { %v1036_v54 = vpop.f32.mrb[4].mxu0 }
 0x163   :  { %v1058_v55 = vpop.f32.mrb[4].mxu1  ;;  %v1037_v56 = vpop.f32.mrb[5].mxu0 }
 0x164   :  { %v1059_v57 = vpop.f32.mrb[5].mxu1  ;;  %v1038_v58 = vadd.f32 %v1037_v56, %v1036_v54  ;;  %v1039_v60 = vpop.f32.mrb[6].mxu0 }
 0x165   :  { %v1060_v59 = vadd.f32 %v1059_v57, %v1058_v55  ;;  %v1061_v61 = vpop.f32.mrb[6].mxu1  ;;  %v1040_v62 = vpop.f32.mrb[7].mxu0 }
 0x166   :  { %v1062_v63 = vpop.f32.mrb[7].mxu1  ;;  %v735_v0 = vadd.f32 %v1038_v58, %v695_v53 }
 0x168   :  { %v775_v1 = vadd.f32 %v1060_v59, %v735_v0 }
 0x16a   :  { %v780_v2 = vmax.f32 %v775_v1, 0.0 }
 0x16c   :  { %1114 = vmatmul.mubr.f32.vlgmr.msra.gmra.mrb[8].mxu0 %v780_v2 }
 0x23f   :  { %v873_v4 = vpop.f32.mrb[8].mxu0 }
 0x240   :  { %v874_v5 = vadd.f32 %v873_v4, %v805_v3  ;;  %v1115_v6 = vpop.f32.mrb[9].mxu0 }
 0x242   :  { %v975_v7 = vmul.f32 -1.442695, %v874_v5 }
 0x244   :  { %1226 = vpow2.f32 %v975_v7 }
 0x24e   :  { %v1227_v8 = vpop.eup %1226 }
 0x24f   :  { %v880_v9 = vadd.f32 1.0, %v1227_v8 }
 0x251   :  { %1228 = vrcp.f32 %v880_v9 }
 0x25b   :  { %v1229_v10 = vpop.eup %1228 }
 0x25c   :  { %884 = vst.msk [vmem:[#allocation11] sm:$0xff] %vm883_vm1, %v1229_v10 }
 0x25d   :  { %1329 = shalt.err (!%p1326_p8)
}
 0x25e   :  { %s1330_s20 = scalar_lea.hbm %s1459_s5, 128 }
 0x25f   :  { %p1331_p9 = scmp.ne.s32.totalorder %s1459_s5, %s1330_s20  ;;  %p1334_p10 = scmp.lt.u32.totalorder %s1330_s20, %s1459_s5 }
 0x261   :  { %p1336_p11 = pnand %p1334_p10, %p1331_p9 }
 0x263   :  { %1339 = shalt.err (!%p1336_p11)
}
 0x264   :  { %894 = dma.vmem_to_hbm [thread:$0]  %s892_s17, 128, %s1459_s5, [#allocation5]  }
 0x265   :  { %1346 = dma.done.wait [#allocation5], 128  }
 0x266   :  { %1347 = vsyncadd [#allocation5], 4294967168 }
 0x267   :  { %898 = vsyncpa [#allocation4], 1 }
 0x268   :  { %899 = vsyncpa [#allocation7], 1 }
 0x269   :  { %900 = vsyncpa [#allocation10], 1 }
 0x26a   :  { %901 = vsyncpa [#allocation5], 1 }

// kernel: tile.14
= control target key start
LH: loop header
LB: loop body
LE: loop exit
PB: predicated region body
PF: predicated region fallthrough
CT: control target
= control target key end

     0   :  { %s167_s10 = smov 120   ;;  %s168_s11 = smov 104   ;;  %vm4_vm0 = vcmask 64512   ;;  %s253_s0 = inlined_call_operand.vmem [shape: f32[16,8], index: 0, kind: input, shape index: {}]   ;;  %s254_s1 = inlined_call_operand.hbm [shape: f32[1,128], index: 1, kind: output, shape index: {}]  }
   0x1   :  { %v112_v0 = vld [vmem:[%s253_s0 + $0xf] sm:$0x1]   ;;  %v114_v1 = vld [vmem:[%s253_s0 + $0xd] sm:$0x1]   ;;  %v113_v2 = vld [vmem:[%s253_s0 + $0xe] sm:$0x1]  }
   0x2   :  { %8 = vrot.lane.b32.xlu0 %v112_v0, %s167_s10  ;;  %20 = vrot.lane.b32.xlu1 %v114_v1, %s168_s11  ;;  %v115_v3 = vld [vmem:[%s253_s0 + $0xc] sm:$0x1]   ;;  %s169_s16 = smov 112   ;;  %s170_s17 = smov 96   ;;  %v116_v4 = vld [vmem:[%s253_s0 + $0xb] sm:$0x1]  }
   0x3   :  { %v117_v5 = vld [vmem:[%s253_s0 + $0xa] sm:$0x1]   ;;  %v3_v6 = vld [vmem:[%s253_s0] sm:$0x1]  }
   0x6   :  { %14 = vrot.lane.b32.xlu0 %v113_v2, %s169_s16  ;;  %26 = vrot.lane.b32.xlu1 %v115_v3, %s170_s17 }
   0x7   :  { %2 = vsyncpa [#allocation1], 0  ;;  %s171_s24 = smov 88   ;;  %s172_s25 = smov 80   ;;  %5 = vst.msk [vmem:[#allocation2] sm:$0x1] %vm4_vm0, %v3_v6  }
   0x8   :  { %v118_v7 = vld [vmem:[%s253_s0 + $0x9] sm:$0x1]   ;;  %v119_v8 = vld [vmem:[%s253_s0 + $0x8] sm:$0x1]   ;;  %s173_s30 = smov 72   ;;  %s174_s2 = smov 64  }
   0x9   :  { %v120_v9 = vld [vmem:[%s253_s0 + $0x7] sm:$0x1]   ;;  %v121_v10 = vld [vmem:[%s253_s0 + $0x6] sm:$0x1]   ;;  %s175_s7 = smov 56   ;;  %s176_s8 = smov 48  }
   0xa   :  { %32 = vrot.lane.b32.xlu0 %v116_v4, %s171_s24  ;;  %38 = vrot.lane.b32.xlu1 %v117_v5, %s172_s25  ;;  %v122_v11 = vld [vmem:[%s253_s0 + $0x5] sm:$0x1]   ;;  %v123_v12 = vld [vmem:[%s253_s0 + $0x4] sm:$0x1]   ;;  %s177_s13 = smov 40   ;;  %s178_s14 = smov 32  }
   0xb   :  { %v124_v13 = vld [vmem:[%s253_s0 + $0x3] sm:$0x1]   ;;  %v125_v14 = vld [vmem:[%s253_s0 + $0x2] sm:$0x1]   ;;  %s179_s19 = smov 24   ;;  %s180_s20 = smov 16  }
   0xc   :  { %v126_v15 = vld [vmem:[%s253_s0 + $0x1] sm:$0x1]   ;;  %s181_s0 = smov 8   ;;  %vm10_vm1 = vcmask 1048512   ;;  %vm16_vm2 = vcmask 982912   ;;  %vm22_vm3 = vcmask 917312  }
   0xd   :  { %vm28_vm4 = vcmask 851712   ;;  %vm34_vm5 = vcmask 786112   ;;  %vm40_vm6 = vcmask 720512   ;;  %vm46_vm7 = vcmask 654912   ;;  %s182_s23 = smov [#allocation0]  }
   0xe   :  { %44 = vrot.lane.b32.xlu0 %v118_v7, %s173_s30  ;;  %50 = vrot.lane.b32.xlu1 %v119_v8, %s174_s2  ;;  %vm52_vm8 = vcmask 589312   ;;  %vm58_vm9 = vcmask 523712   ;;  %vm64_vm10 = vcmask 458112   ;;  %vm70_vm11 = vcmask 392512   ;;  %s106_s24 = sshll.u32 %s182_s23, 4  ;;  %s107_s24 = int_to_ptr.vmem [resolvable:$true] %s106_s24 }
   0xf   :  { %vm76_vm12 = vcmask 326912   ;;  %vm82_vm13 = vcmask 261312   ;;  %vm88_vm14 = vcmask 195712   ;;  %vm94_vm15 = vcmask 130112   ;;  %s143_s25 = scalar_lea.vmem %s107_s24, 16  ;;  %s147_s26 = scalar_lea.vmem %s107_s24, 32 }
  0x10   :  { %p144_p0 = scmp.ne.s32.totalorder %s107_s24, %s143_s25  ;;  %p148_p1 = scmp.lt.s32.totalorder %s107_s24, %s107_s24 }
  0x11   :  { %p149_p2 = scmp.lt.s32.totalorder %s147_s26, %s143_s25 }
  0x12   :  { %56 = vrot.lane.b32.xlu0 %v120_v9, %s175_s7  ;;  %62 = vrot.lane.b32.xlu1 %v121_v10, %s176_s8 }
  0x13   :  { %p150_p3 = por %p149_p2, %p148_p1 }
  0x15   :  { %p151_p4 = pnand %p150_p3, %p144_p0 }
  0x16   :  { %68 = vrot.lane.b32.xlu0 %v122_v11, %s177_s13  ;;  %74 = vrot.lane.b32.xlu1 %v123_v12, %s178_s14 }
  0x1a   :  { %80 = vrot.lane.b32.xlu0 %v124_v13, %s179_s19  ;;  %86 = vrot.lane.b32.xlu1 %v125_v14, %s180_s20 }
  0x1e   :  { %92 = vrot.lane.b32.xlu0 %v126_v15, %s181_s0 }
  0x74   :  { %v9_v16 = vpop.permute.xlu0 %8   ;;  %v21_v17 = vpop.permute.xlu1 %20  }
  0x75   :  { %11 = vst.msk [vmem:[#allocation2] sm:$0x1] %vm10_vm1, %v9_v16  }
  0x78   :  { %v15_v18 = vpop.permute.xlu0 %14   ;;  %v27_v19 = vpop.permute.xlu1 %26  }
  0x79   :  { %17 = vst.msk [vmem:[#allocation2] sm:$0x1] %vm16_vm2, %v15_v18  }
  0x7a   :  { %23 = vst.msk [vmem:[#allocation2] sm:$0x1] %vm22_vm3, %v21_v17  }
  0x7b   :  { %29 = vst.msk [vmem:[#allocation2] sm:$0x1] %vm28_vm4, %v27_v19  }
  0x7c   :  { %v33_v20 = vpop.permute.xlu0 %32   ;;  %v39_v21 = vpop.permute.xlu1 %38  }
  0x7d   :  { %35 = vst.msk [vmem:[#allocation2] sm:$0x1] %vm34_vm5, %v33_v20  }
  0x7e   :  { %41 = vst.msk [vmem:[#allocation2] sm:$0x1] %vm40_vm6, %v39_v21  }
  0x80   :  { %v45_v22 = vpop.permute.xlu0 %44   ;;  %v51_v23 = vpop.permute.xlu1 %50  }
  0x81   :  { %47 = vst.msk [vmem:[#allocation2] sm:$0x1] %vm46_vm7, %v45_v22  }
  0x82   :  { %53 = vst.msk [vmem:[#allocation2] sm:$0x1] %vm52_vm8, %v51_v23  }
  0x84   :  { %v57_v24 = vpop.permute.xlu0 %56   ;;  %v63_v25 = vpop.permute.xlu1 %62  }
  0x85   :  { %59 = vst.msk [vmem:[#allocation2] sm:$0x1] %vm58_vm9, %v57_v24  }
  0x86   :  { %65 = vst.msk [vmem:[#allocation2] sm:$0x1] %vm64_vm10, %v63_v25  }
  0x88   :  { %v69_v26 = vpop.permute.xlu0 %68   ;;  %v75_v27 = vpop.permute.xlu1 %74  }
  0x89   :  { %71 = vst.msk [vmem:[#allocation2] sm:$0x1] %vm70_vm11, %v69_v26  }
  0x8a   :  { %77 = vst.msk [vmem:[#allocation2] sm:$0x1] %vm76_vm12, %v75_v27  }
  0x8c   :  { %v81_v28 = vpop.permute.xlu0 %80   ;;  %v87_v29 = vpop.permute.xlu1 %86  }
  0x8d   :  { %83 = vst.msk [vmem:[#allocation2] sm:$0x1] %vm82_vm13, %v81_v28  }
  0x8e   :  { %89 = vst.msk [vmem:[#allocation2] sm:$0x1] %vm88_vm14, %v87_v29  }
  0x90   :  { %v93_v30 = vpop.permute.xlu0 %92  }
  0x91   :  { %95 = vst.msk [vmem:[#allocation2] sm:$0x1] %vm94_vm15, %v93_v30  }
  0x98   :  { %v99_v31 = vld [vmem:[#allocation2] sm:$0x1] }
  0x99   :  { %101 = vst [vmem:[#allocation0] sm:$0x1] %v99_v31 }
  0x9a   :  { %154 = shalt.err (!%p151_p4)
}
  0x9b   :  { %s155_s29 = scalar_lea.hbm %s254_s1, 16 }
  0x9c   :  { %p156_p5 = scmp.ne.s32.totalorder %s254_s1, %s155_s29  ;;  %p159_p6 = scmp.lt.u32.totalorder %s155_s29, %s254_s1 }
  0x9e   :  { %p161_p7 = pnand %p159_p6, %p156_p5 }
  0xa0   :  { %164 = shalt.err (!%p161_p7)
}
  0xa1   :  { %109 = dma.vmem_to_hbm [thread:$0]  %s107_s24, 16, %s254_s1, [#allocation1]  }
  0xa2   :  { %165 = dma.done.wait [#allocation1], 16  }
  0xa3   :  { %166 = vsyncadd [#allocation1], 4294967280 }
  0xa4   :  { %111 = vsyncpa [#allocation1], 1 }

// kernel: multi_attention_block.6
= control target key start
LH: loop header
LB: loop body
LE: loop exit
PB: predicated region body
PF: predicated region fallthrough
CT: control target
= control target key end

     0   :  { %s2257_s0 = inlined_call_operand.hbm [shape: bf16[64,128], index: 0, kind: input, shape index: {}]   ;;  %s2258_s1 = inlined_call_operand.hbm [shape: f32[64,16], index: 1, kind: input, shape index: {}]   ;;  %s2259_s2 = inlined_call_operand.hbm [shape: f32[16,128], index: 2, kind: input, shape index: {}]   ;;  %s2260_s3 = inlined_call_operand.hbm [shape: bf16[128,128], index: 3, kind: input, shape index: {}]   ;;  %s2261_s4 = inlined_call_operand.hbm [shape: f32[1,128], index: 4, kind: input, shape index: {}]   ;;  %s2262_s5 = inlined_call_operand.hbm [shape: bf16[64,128], index: 5, kind: output, shape index: {0}]   ;;  %s2263_s6 = inlined_call_operand.hbm [shape: f32[2,1,128], index: 6, kind: output, shape index: {1}]   ;;  %s2264_s7 = inlined_call_operand.hbm [shape: f32[2,128,128], index: 7, kind: output, shape index: {2}]  }
   0x1   :  { %2272 = sst [smem:[#allocation22_spill]] %s2257_s0 }
   0x2   :  { %2273 = sst [smem:[#allocation23_spill]] %s2259_s2 }
   0x3   :  { %2274 = sst [smem:[#allocation24_spill]] %s2260_s3 }
   0x4   :  { %2275 = sst [smem:[#allocation25_spill]] %s2261_s4 }
   0x5   :  { %13 = vsyncpa [#allocation3], 0 }
   0x6   :  { %15 = vsyncpa [#allocation3 + $0x1], 0 }
   0x7   :  { %16 = vsyncpa [#allocation6], 0 }
   0x8   :  { %18 = vsyncpa [#allocation6 + $0x1], 0 }
   0x9   :  { %19 = vsyncpa [#allocation9], 0 }
   0xa   :  { %20 = vsyncpa [#allocation4], 0 }
   0xb   :  { %22 = vsyncpa [#allocation4 + $0x1], 0 }
   0xc   :  { %23 = vsyncpa [#allocation13], 0 }
   0xd   :  { %25 = vsyncpa [#allocation13 + $0x1], 0  ;;  %s1818_s24 = smov 0   ;;  %s1820_s25 = smov 0  }
   0xe   :  { %s1822_s26 = smov 0   ;;  %s1824_s27 = smov 0  }
   0xf LB: > { %s1839_s28 = sadd.s32 4294967295, %s1760_s27   ;;  %s2266_s29 = sadd.s32 4294967294, %s1760_s27   ;;  %s1760_s27 = sphi %s1824_s27, %s2305_s27   ;;  %s1756_s26 = sphi %s1822_s26, %s2304_s26   ;;  %s1752_s25 = sphi %s1820_s25, %s2303_s25   ;;  %s1748_s24 = sphi %s1818_s24, %s2302_s24  }
  0x10   : > { %p51_p0 = scmp.ne.s32.totalorder %s1752_s25, %s1748_s24  ;;  %p2265_p1 = scmp.eq.s32.totalorder %s1839_s28, 0 }
  0x11   : > { %p170_p3 = scmp.eq.s32.totalorder %s2266_s29, 1  ;;  %p1169_p5 = scmp.ge.s32.totalorder %s1760_s27, 1 }
  0x12   : > { %p1850_p4 = por %p2265_p1, %p51_p0  ;;  %p229_p7 = scmp.lt.s32.totalorder %s1760_s27, 3 }
  0x13   : > { %p1855_p6 = por %p170_p3, %p51_p0  ;;  %s1762_s10 = smov [#allocation7]  }
  0x14   : > { %s2276_s30 = scalar_select %p1850_p4, 1, 0 }
  0x15   : > { %s2277_s8 = scalar_select %p1855_p6, 1, 0 }
  0x16   : > { %p1860_p8 = pnand %p1169_p5, %p229_p7  ;;  %s241_s11 = sshll.u32 %s1762_s10, 4  ;;  %s1864_s11 = int_to_ptr.vmem [resolvable:$true] %s241_s11 }
  0x17   : > { %2278 = sst [smem:[#allocation21_spill]] %s2277_s8  ;;  %s1763_s13 = smov [#allocation8]  }
  0x18   : > { %s2279_s9 = scalar_select %p1860_p8, 1, 0 }
  0x19   : > { %p1391_p9 = pneg %p1860_p8  ;;  %s254_s14 = sshll.u32 %s1763_s13, 4  ;;  %s1875_s14 = int_to_ptr.vmem [resolvable:$true] %s254_s14 }
  0x1a   : > { %s2281_s2 = sld [smem:[#allocation23_spill]] }
  0x1b   : > { %p1871_p11 = pnand %p1391_p9, %p2265_p1 }
  0x1d   : > { %p1885_p13 = pneg %p1871_p11 }
  0x20   : > { %s1478_s17 = scalar_lea.hbm %s2281_s2, 256 }
  0x21   : > { %p1479_p12 = scmp.ne.s32.totalorder %s2281_s2, %s1478_s17  ;;  %p1485_p5 = scmp.lt.u32.totalorder %s1478_s17, %s2281_s2 }
  0x23   : > { %p1481_p0 = pnand %p1885_p13, %p1479_p12 }
  0x25   : > { %p1482_p3 = pneg %p1481_p0 }
  0x27   : > { %p1487_p7 = pnand %p1485_p5, %p1482_p3 }
  0x29   : > { %1490 = shalt.err (!%p1487_p7)
}
  0x2a   : > { %s1491_s23 = scalar_lea.vmem %s1864_s11, 256  ;;  %p1499_p2 = scmp.lt.s32.totalorder %s1864_s11, %s1864_s11 }
  0x2b   : > { %p1492_p9 = scmp.ne.s32.totalorder %s1864_s11, %s1491_s23  ;;  %p1500_p6 = scmp.lt.s32.totalorder %s1491_s23, %s1491_s23 }
  0x2d   : > { %p1494_p10 = pnand %p1492_p9, %p1885_p13  ;;  %p1501_p12 = por %p1500_p6, %p1499_p2 }
  0x2f   : > { %p1495_p1 = pneg %p1494_p10 }
  0x31   : > { %p1502_p0 = pnand %p1501_p12, %p1495_p1 }
  0x33   : > { %1505 = shalt.err (!%p1502_p0)
}
  0x34   : > { %s2267_s10 = smov 128   ;;  %s2268_s13 = smov 8  }
  0x35   : > { %1394 = dma.hbm_to_vmem [thread:$0]  (!%p1871_p11), %s2281_s2, 256, %s1864_s11, [#allocation6], %s2267_s10, %s2267_s10, %s2268_s13  }
  0x36   : > { %s2283_s3 = sld [smem:[#allocation24_spill]] }
  0x3c   : > { %s1506_s19 = scalar_lea.hbm %s2283_s3, 1024 }
  0x3d   : > { %p1507_p1 = scmp.ne.s32.totalorder %s2283_s3, %s1506_s19  ;;  %p1513_p10 = scmp.lt.u32.totalorder %s1506_s19, %s2283_s3 }
  0x3f   : > { %p1509_p2 = pnand %p1507_p1, %p1885_p13 }
  0x41   : > { %p1510_p6 = pneg %p1509_p2 }
  0x43   : > { %p1515_p3 = pnand %p1513_p10, %p1510_p6 }
  0x45   : > { %1518 = shalt.err (!%p1515_p3)
}
  0x46   : > { %s1519_s11 = scalar_lea.vmem %s1875_s14, 1024  ;;  %p1527_p12 = scmp.lt.s32.totalorder %s1875_s14, %s1875_s14 }
  0x47   : > { %p1520_p5 = scmp.ne.s32.totalorder %s1875_s14, %s1519_s11  ;;  %p1528_p0 = scmp.lt.s32.totalorder %s1519_s11, %s1519_s11 }
  0x49   : > { %p1522_p7 = pnand %p1520_p5, %p1885_p13  ;;  %p1529_p1 = por %p1528_p0, %p1527_p12 }
  0x4b   : > { %p1523_p9 = pneg %p1522_p7 }
  0x4d   : > { %p1530_p2 = pnand %p1529_p1, %p1523_p9 }
  0x4f   : > { %1533 = shalt.err (!%p1530_p2)
}
  0x50   : > { %s1766_s15 = smov 64   ;;  %s1767_s29 = smov 4  }
  0x51   : > { %1397 = dma.hbm_to_vmem [thread:$0]  (!%p1871_p11), %s2283_s3, 1024, %s1875_s14, [#allocation9], %s1766_s15, %s1766_s15, %s1767_s29  }
  0x52   : > { %s1768_s18 = smov [#allocation10]   ;;  %s1936_s21 = sadd.s32 1, %s1760_s27  }
  0x53   : > { %s268_s19 = sshll.u32 %s1768_s18, 4  ;;  %s2284_s4 = sld [smem:[#allocation25_spill]]  ;;  %s269_s19 = int_to_ptr.vmem [resolvable:$true] %s268_s19 }
  0x59   : > { %s1534_s11 = scalar_lea.hbm %s2284_s4, 16 }
  0x5a   : > { %p1535_p6 = scmp.ne.s32.totalorder %s2284_s4, %s1534_s11  ;;  %p1541_p5 = scmp.lt.u32.totalorder %s1534_s11, %s2284_s4 }
  0x5c   : > { %p1537_p10 = pnand %p1535_p6, %p1885_p13 }
  0x5e   : > { %p1538_p3 = pneg %p1537_p10 }
  0x60   : > { %p1543_p7 = pnand %p1541_p5, %p1538_p3 }
  0x62   : > { %1546 = shalt.err (!%p1543_p7)
}
  0x63   : > { %s1547_s14 = scalar_lea.vmem %s269_s19, 16  ;;  %s1554_s16 = scalar_lea.vmem %s269_s19, 32 }
  0x64   : > { %p1548_p9 = scmp.ne.s32.totalorder %s269_s19, %s1547_s14  ;;  %p1555_p1 = scmp.lt.s32.totalorder %s269_s19, %s269_s19 }
  0x65   : > { %p1556_p2 = scmp.lt.s32.totalorder %s1554_s16, %s1547_s14 }
  0x66   : > { %p1550_p12 = pnand %p1548_p9, %p1885_p13 }
  0x67   : > { %p1557_p4 = por %p1556_p2, %p1555_p1 }
  0x68   : > { %p1551_p0 = pneg %p1550_p12 }
  0x6a   : > { %p1558_p8 = pnand %p1557_p4, %p1551_p0 }
  0x6c   : > { %1561 = shalt.err (!%p1558_p8)
}
  0x6d   : > { %1400 = dma.hbm_to_vmem [thread:$0]  (!%p1871_p11), %s2284_s4, 16, %s269_s19, [#allocation9]  }
  0x6e   : > { %s35_s2 = ssub.s32 %s1760_s27, %s1936_s21  ;;  %s38_s8 = sadd.s32 1, %s1756_s26 }
  0x6f   : > { %p36_p4 = scmp.eq.s32.totalorder %s35_s2, 0  ;;  %p45_p8 = scmp.ne.s32.totalorder %s1756_s26, %s1752_s25 }
  0x70   : > { %p46_p13 = scmp.eq.s32.totalorder %s1760_s27, 0  ;;  %p1421_p6 = scmp.lt.s32.totalorder %s1760_s27, 2 }
  0x71   : > { %s1964_s12 = scalar_select %p36_p4, %s1756_s26, %s38_s8  }
  0x72   : > { %p47_p10 = por %p46_p13, %p45_p8  ;;  %p2285_p3 = scmp.eq.s32.totalorder %s1839_s28, 1 }
  0x73   : > { %s1973_s17 = sand.u32 1, %s1756_s26   ;;  %s1236_s18 = sshll.u32 %s1760_s27, 8 }
  0x74   : > { %p1968_p5 = por %p2285_p3, %p45_p8  ;;  %s1174_s19 = sshll.u32 %s1973_s17, 4 }
  0x75   : > { %s2287_s0 = sld [smem:[#allocation22_spill]]  ;;  %s283_s14 = scalar_lea.vmem [#allocation2], %s1174_s19 }
  0x76   : > { %s290_s16 = sshll.u32 %s283_s14, 4  ;;  %p1982_p11 = pnand %p1421_p6, %p47_p10  ;;  %s1986_s16 = int_to_ptr.vmem [resolvable:$true] %s290_s16 }
  0x77   : > { %s280_s2 = scalar_lea.sflag [#allocation3], %s1973_s17 }
  0x78   : > { %p1564_p9 = pneg %p1982_p11 }
  0x7b   : > { %s1980_s11 = scalar_lea.hbm %s2287_s0, %s1236_s18  ;;  %s1567_s22 = scalar_lea.hbm %s2287_s0, 512 }
  0x7c   : > { %s1562_s8 = scalar_lea.hbm %s1980_s11, 256  ;;  %p1568_p1 = scmp.lt.u32.totalorder %s1980_s11, %s2287_s0 }
  0x7d   : > { %p1563_p7 = scmp.ne.s32.totalorder %s1980_s11, %s1562_s8  ;;  %p1569_p2 = scmp.lt.u32.totalorder %s1567_s22, %s1562_s8 }
  0x7e   : > { %p1571_p8 = scmp.lt.u32.totalorder %s1562_s8, %s1980_s11 }
  0x7f   : > { %p1565_p12 = pnand %p1564_p9, %p1563_p7  ;;  %p1570_p4 = por %p1569_p2, %p1568_p1 }
  0x81   : > { %p1566_p0 = pneg %p1565_p12  ;;  %p1572_p13 = por %p1571_p8, %p1570_p4 }
  0x83   : > { %p1573_p6 = pnand %p1572_p13, %p1566_p0 }
  0x85   : > { %1576 = shalt.err (!%p1573_p6)
}
  0x86   : > { %s1577_s13 = scalar_lea.vmem %s1986_s16, 256  ;;  %s1769_s18 = smov [#allocation2]  }
  0x87   : > { %p1578_p10 = scmp.ne.s32.totalorder %s1986_s16, %s1577_s13  ;;  %s1582_s19 = sshll.u32 %s1769_s18, 4  ;;  %s1583_s19 = int_to_ptr.vmem [resolvable:$false] %s1582_s19 }
  0x88   : > { %s1584_s23 = scalar_lea.vmem %s1583_s19, 512  ;;  %p1585_p12 = scmp.lt.s32.totalorder %s1986_s16, %s1583_s19 }
  0x89   : > { %p1580_p3 = pnand %p1578_p10, %p1564_p9  ;;  %p1586_p1 = scmp.lt.s32.totalorder %s1584_s23, %s1577_s13 }
  0x8b   : > { %p1581_p7 = pneg %p1580_p3  ;;  %p1587_p2 = por %p1586_p1, %p1585_p12 }
  0x8d   : > { %p1588_p4 = pnand %p1587_p2, %p1581_p7 }
  0x8f   : > { %1591 = shalt.err (!%p1588_p4)
}
  0x90   : > { %1404 = dma.hbm_to_vmem [thread:$0]  (!%p1982_p11), %s1980_s11, 256, %s1986_s16, %s280_s2, %s1766_s15, %s1766_s15, %s1767_s29  }
  0x91   : > { %s1177_s8 = sshll.u32 %s1973_s17, 5  ;;  %s1237_s22 = sshll.u32 %s1760_s27, 9 }
  0x92   : > { %s2025_s18 = scalar_lea.hbm %s2258_s1, %s1237_s22  ;;  %s304_s19 = scalar_lea.vmem [#allocation5], %s1177_s8 }
  0x93   : > { %s311_s23 = sshll.u32 %s304_s19, 4  ;;  %s2289_s0 = sand.u32 1, %s1760_s27   ;;  %s2027_s23 = int_to_ptr.vmem [resolvable:$true] %s311_s23 }
  0x94   : > { %s2031_s3 = scalar_lea.sflag [#allocation6], %s2289_s0  ;;  %s1592_s4 = scalar_lea.hbm %s2025_s18, 512 }
  0x95   : > { %p1593_p0 = scmp.ne.s32.totalorder %s2025_s18, %s1592_s4  ;;  %s1597_s17 = scalar_lea.hbm %s2258_s1, 1024 }
  0x96   : > { %p1598_p6 = scmp.lt.u32.totalorder %s2025_s18, %s2258_s1  ;;  %p1599_p10 = scmp.lt.u32.totalorder %s1597_s17, %s1592_s4 }
  0x97   : > { %p1595_p8 = pnand %p1593_p0, %p1564_p9  ;;  %p1601_p7 = scmp.lt.u32.totalorder %s1592_s4, %s2025_s18 }
  0x98   : > { %p1600_p3 = por %p1599_p10, %p1598_p6 }
  0x99   : > { %p1596_p13 = pneg %p1595_p8 }
  0x9a   : > { %p1602_p12 = por %p1601_p7, %p1600_p3 }
  0x9c   : > { %p1603_p1 = pnand %p1602_p12, %p1596_p13 }
  0x9e   : > { %1606 = shalt.err (!%p1603_p1)
}
  0x9f   : > { %s1607_s0 = scalar_lea.vmem %s2027_s23, 512  ;;  %s1770_s2 = smov [#allocation5]  }
  0xa0   : > { %p1608_p2 = scmp.ne.s32.totalorder %s2027_s23, %s1607_s0  ;;  %s1612_s8 = sshll.u32 %s1770_s2, 4  ;;  %s1613_s8 = int_to_ptr.vmem [resolvable:$false] %s1612_s8 }
  0xa1   : > { %s1614_s22 = scalar_lea.vmem %s1613_s8, 1024  ;;  %p1615_p8 = scmp.lt.s32.totalorder %s2027_s23, %s1613_s8 }
  0xa2   : > { %p1610_p4 = pnand %p1608_p2, %p1564_p9  ;;  %p1616_p6 = scmp.lt.s32.totalorder %s1614_s22, %s1607_s0 }
  0xa4   : > { %p1611_p0 = pneg %p1610_p4  ;;  %p1617_p10 = por %p1616_p6, %p1615_p8 }
  0xa6   : > { %p1618_p3 = pnand %p1617_p10, %p1611_p0 }
  0xa8   : > { %1621 = shalt.err (!%p1618_p3)
}
  0xa9   : > { %s2290_s4 = smov 8   ;;  %s2291_s13 = smov 128  }
  0xaa   : > { %1407 = dma.hbm_to_vmem [thread:$0]  (!%p1982_p11), %s2025_s18, 512, %s2027_s23, %s2031_s3, %s2291_s13, %s2291_s13, %s2290_s4  }
  0xab   : > { %p2292_p9 = scmp.ne.s32.totalorder %s2279_s9, 0 }
  0xac   : > { %s2063_s14 = sand.u32 (!%p2292_p9), 1, %s1752_s25   ;;  %p2293_p13 = scmp.ne.s32.totalorder (!%p2292_p9), %s2276_s30, 0 }
  0xad   : > { %323 = sbr.rel (%p2292_p9) target bundleno = 1051 (0x41b), region = 40  ;;  %s1181_s19 = sshll.u32 (!%p2292_p9), %s2063_s14, 4 }
  0xae   : > { %s326_s15 = scalar_lea.sflag (!%p2292_p9), [#allocation3], %s2063_s14  ;;  %s2069_s10 = scalar_lea.vmem (!%p2292_p9), [#allocation2], %s1181_s19 }
  0xb4   : > { %1723 = dma.done.wait (%p2293_p13), %s326_s15, 256  }
  0xb5   : > { %1725 = vsyncadd (%p2293_p13), %s326_s15, 4294967040  ;;  %s334_s3 = sand.u32 1, %s1839_s28   ;;  %s1182_s9 = sshll.u32 %s2063_s14, 5 }
  0xb6   : > { %s335_s18 = scalar_lea.sflag [#allocation6], %s334_s3  ;;  %s338_s23 = scalar_lea.vmem [#allocation5], %s1182_s9 }
  0xb7   : > { %1727 = dma.done.wait (%p2293_p13), %s335_s18, 512  }
  0xb8   : > { %1729 = vsyncadd (%p2293_p13), %s335_s18, 4294966784  ;;  %p2294_p11 = scmp.eq.s32.totalorder %s1839_s28, 0 }
  0xba   : > { %1731 = dma.done.wait (%p2294_p11), [#allocation6], 256   ;;  %p2295_p7 = pmov %p2294_p11 }
  0xbc   : > { %1733 = vsyncadd (%p2295_p7), [#allocation6], 4294967040  ;;  %p2296_p12 = pmov %p2295_p7 }
  0xbd   : > { %p2297_p1 = pmov %p2295_p7 }
  0xbe   : > { %1735 = dma.done.wait (%p2296_p12), [#allocation9], 1040  }
  0xbf   : > { %1737 = vsyncadd (%p2297_p1), [#allocation9], 4294966256  ;;  %vm405_vm0 = vcmask 130048   ;;  %v403_v0 = vld [vmem:[#allocation7] sm:$0xff]  ;;  %v404_v1 = vld [vmem:[#allocation7 + $0x8] sm:$0xff]  ;;  %s2101_s30 = scalar_lea.vmem [#allocation11], %s1181_s19 }
  0xc0   : > { %v399_v2 = vld [vmem:[%s338_s23] sm:$0xff]  ;;  %v1357_v3 = vpack.c.bf16 %v404_v1, %v403_v0  ;;  %v1470_v4 = vld [vmem:[#allocation8] sm:$0xff]   ;;  %v1471_v5 = vld [vmem:[#allocation8 + $0x8] sm:$0xff]   ;;  %s387_s29 = scalar_lea.vmem [#allocation12], %s2063_s14  ;;  %vm725_vm1 = vcmask 261120   ;;  %s1231_s17 = sshll.u32 %s1839_s28, 4 }
  0xc1   : > { %1299 = vmatprep.mubr.msk.f32.mxu0 %vm405_vm0, %v399_v2  ;;  %v400_v6 = vld [vmem:[%s338_s23 + $0x8] sm:$0xff]  ;;  %1305 = vmatprep.subr.bf16.mxu1 %v1470_v4  ;;  %v401_v7 = vld [vmem:[%s338_s23 + $0x10] sm:$0xff]  ;;  %v402_v8 = vld [vmem:[%s338_s23 + $0x18] sm:$0xff]  ;;  %s974_s11 = sshll.u32 %s387_s29, 4  ;;  %s2130_s2 = scalar_lea.hbm %s2263_s6, %s1231_s17  ;;  %s975_s11 = int_to_ptr.vmem [resolvable:$true] %s974_s11 }
  0xc2   : > { %1358 = vmatprep.subr.bf16.mxu0 %v1357_v3  ;;  %1306 = vmatpush3.bf16.msra.mxu1 %v1470_v4  ;;  %v1472_v9 = vld [vmem:[#allocation8 + $0x10] sm:$0xff]   ;;  %v1473_v10 = vld [vmem:[#allocation8 + $0x18] sm:$0xff]   ;;  %v1474_v11 = vld [vmem:[#allocation8 + $0x20] sm:$0xff]   ;;  %s2134_s8 = scalar_lea.sflag [#allocation13], %s334_s3  ;;  %s1622_s22 = scalar_lea.vmem %s975_s11, 16 }
  0xc3   : > { %1360 = vmatpush3.bf16.msra.mxu0 %v1357_v3  ;;  %1307 = vmatprep.subr.bf16.mxu1 %v1471_v5  ;;  %v1475_v12 = vld [vmem:[#allocation8 + $0x28] sm:$0xff]   ;;  %v1476_v13 = vld [vmem:[#allocation8 + $0x30] sm:$0xff]   ;;  %v1477_v14 = vld [vmem:[#allocation8 + $0x38] sm:$0xff]   ;;  %p1623_p2 = scmp.ne.s32.totalorder %s975_s11, %s1622_s22  ;;  %s1771_s4 = smov [#allocation12]  }
  0xc4   : > { %v506_v16 = vld [vmem:[%s2069_s10 + $0x4] sm:$0xf]  ;;  %v505_v19 = vld [vmem:[%s2069_s10] sm:$0xf]  ;;  %v508_v23 = vld [vmem:[%s2069_s10 + $0xc] sm:$0xf] }
  0xc5   : > { %v507_v27 = vld [vmem:[%s2069_s10 + $0x8] sm:$0xf]  ;;  %v1206_v34 = vld [vmem:[#allocation10] ss:$0 sm:$0xff]  ;;  %p1624_p4 = pnand %p1623_p2, %p1968_p5  ;;  %s1626_s13 = sshll.u32 %s1771_s4, 4  ;;  %s1627_s13 = int_to_ptr.vmem [resolvable:$false] %s1626_s13 }
  0xc6   : > { %1300 = vmatmul.mubr.msk.f32.vlgmr.msra.gmra.mrb[0].mxu0 %vm405_vm0, %v400_v6  ;;  %1308 = vmatpush3.bf16.msra.mxu1 %v1471_v5  ;;  %s1628_s19 = scalar_lea.vmem %s1627_s13, 32  ;;  %p1629_p8 = scmp.lt.s32.totalorder %s975_s11, %s1627_s13 }
  0xc7   : > { %1302 = vmatprep.mubr.msk.f32.mxu0 %vm405_vm0, %v401_v7  ;;  %1309 = vmatprep.subr.bf16.mxu1 %v1472_v9  ;;  %p1625_p0 = pneg %p1624_p4  ;;  %p1630_p6 = scmp.lt.s32.totalorder %s1628_s19, %s1622_s22 }
  0xc9   : > { %p1631_p10 = por %p1630_p6, %p1629_p8 }
  0xca   : > { %1303 = vmatmul.mubr.msk.f32.gmra.mrb[2].mxu0 %vm405_vm0, %v402_v8  ;;  %1310 = vmatpush3.bf16.msra.mxu1 %v1472_v9 }
  0xcb   : > { %1311 = vmatprep.subr.bf16.mxu1 %v1473_v10  ;;  %p1632_p3 = pnand %p1631_p10, %p1625_p0 }
  0xce   : > { %1312 = vmatpush3.bf16.msra.mxu1 %v1473_v10 }
  0xcf   : > { %1313 = vmatprep.subr.bf16.mxu1 %v1474_v11 }
  0xd2   : > { %1314 = vmatpush3.bf16.msra.mxu1 %v1474_v11 }
  0xd3   : > { %1315 = vmatprep.subr.bf16.mxu1 %v1475_v12 }
  0xd6   : > { %1316 = vmatpush3.bf16.msra.mxu1 %v1475_v12 }
  0xd7   : > { %1317 = vmatprep.subr.bf16.mxu1 %v1476_v13 }
  0xda   : > { %1318 = vmatpush3.bf16.msra.mxu1 %v1476_v13 }
  0xdb   : > { %1319 = vmatprep.subr.bf16.mxu1 %v1477_v14 }
  0xde   : > { %1320 = vmatpush3.bf16.msra.mxu1 %v1477_v14 }
 0x199   : > { %v1301_v15 = vpop.f32.mrb[0].mxu0 }
 0x19a   : > { %v1239_v17 = vpack.c.bf16 %v1301_v15, %v1301_v15  ;;  %v484_v18 = vpop.f32.mrb[1].mxu0 }
 0x19b   : > { %v1238_v20 = vpack.c.bf16 %v484_v18, %v484_v18 }
 0x19c   : > { %v524_v21 = vmul.bf16 %v1239_v17, %v506_v16 }
 0x19d   : > { %v1304_v22 = vpop.f32.mrb[2].mxu0  ;;  %v523_v24 = vmul.bf16 %v1238_v20, %v505_v19 }
 0x19e   : > { %v1241_v25 = vpack.c.bf16 %v1304_v22, %v1304_v22  ;;  %v494_v26 = vpop.f32.mrb[3].mxu0 }
 0x19f   : > { %v1240_v28 = vpack.c.bf16 %v494_v26, %v494_v26  ;;  %v1196_v29 = vcombine.low %v523_v24, %v524_v21 }
 0x1a0   : > { %v526_v30 = vmul.bf16 %v1241_v25, %v508_v23 }
 0x1a1   : > { %v525_v31 = vmul.bf16 %v1240_v28, %v507_v27  ;;  %1321 = vmatprep.mubr.bf16.mxu1 %v1196_v29 }
 0x1a3   : > { %v1197_v32 = vcombine.low %v525_v31, %v526_v30 }
 0x1a5   : > { %1322 = vmatmul.mubr.bf16.vlgmr.msra.gmra.mrb[0].mxu1 %v1197_v32 }
 0x278   : > { %v1323_v33 = vpop.f32.mrb[0].mxu1 }
 0x279   : > { %v637_v35 = vpop.f32.mrb[1].mxu1  ;;  %v661_v37 = vadd.f32 %v1323_v33, %v1206_v34 }
 0x27a   : > { %693 = vxpose.xlu0.b32.start [1/4] (short) %v637_v35, 128  ;;  %v1324_v36 = vpop.f32.mrb[2].mxu1  ;;  %v659_v41 = vadd.f32 %v1206_v34, %v637_v35 }
 0x27b   : > { %v662_v38 = vadd.f32 %v1324_v36, %v1206_v34  ;;  %v640_v39 = vpop.f32.mrb[3].mxu1  ;;  %v1365_v40 = vpack.c.bf16 %v1324_v36, %v1323_v33 }
 0x27c   : > { %v660_v42 = vadd.f32 %v1206_v34, %v640_v39  ;;  %v683_v43 = vadd.f32 %v640_v39, %v637_v35  ;;  %v1361_v44 = vpack.c.bf16 %v640_v39, %v637_v35 }
 0x27d   : > { %v1256_v45 = vpack.c.bf16 %v662_v38, %v661_v37 }
 0x27e   : > { %v1251_v46 = vpack.c.bf16 %v660_v42, %v659_v41  ;;  %v684_v47 = vadd.f32 %v1323_v33, %v683_v43  ;;  %694 = vxpose.xlu0.b32.cont [2/4] (short) %v640_v39, 128  ;;  %1362 = vmatprep.subr.bf16.mxu0 %v1361_v44 }
 0x27f   : > { %1258 = vst [vmem:[%s2101_s30 + $0x8] sm:$0xff] %v1256_v45   ;;  %1364 = vmatpush3.bf16.msra.mxu0 %v1361_v44 }
 0x280   : > { %1252 = vst [vmem:[%s2101_s30] sm:$0xff] %v1251_v46   ;;  %v685_v48 = vadd.f32 %v1324_v36, %v684_v47  ;;  %1366 = vmatprep.subr.bf16.mxu0 %v1365_v40 }
 0x282   : > { %v686_v49 = vrot.slane %v685_v48, 4  ;;  %695 = vxpose.xlu0.b32.cont [3/4] (short) %v1323_v33, 128 }
 0x283   : > { %1368 = vmatpush3.bf16.msra.mxu0 %v1365_v40 }
 0x284   : > { %v687_v50 = vadd.f32 %v686_v49, %v685_v48 }
 0x286   : > { %v688_v51 = vrot.slane %v687_v50, 2  ;;  %696 = vxpose.xlu0.b32.end [4/4] (short) %v1324_v36, 128 }
 0x288   : > { %v689_v52 = vadd.f32 %v688_v51, %v687_v50 }
 0x28a   : > { %v690_v53 = vrot.slane %v689_v52, 1 }
 0x28c   : > { %v691_v54 = vadd.f32 %v690_v53, %v689_v52 }
 0x28e   : > { %692 = vst [vmem:[%s387_s29] sm:$0x1] %v691_v54 }
 0x2fa   : > { %v709_v55 = vpop.trf.xlu0 }
 0x2fb   : > { %1333 = vmatprep.mubr.msk.f32.mxu0 %vm725_vm1, %v709_v55 }
 0x2fe   : > { %v710_v56 = vpop.trf.xlu0 }
 0x2ff   : > { %1334 = vmatmul.mubr.msk.f32.vlgmr.msra.gmra.mrb[4].mxu0 %vm725_vm1, %v710_v56 }
 0x302   : > { %v711_v57 = vpop.trf.xlu0 }
 0x303   : > { %1336 = vmatprep.mubr.msk.f32.mxu0 %vm725_vm1, %v711_v57 }
 0x306   : > { %v712_v58 = vpop.trf.xlu0 }
 0x307   : > { %1337 = vmatmul.mubr.msk.f32.gmra.mrb[6].mxu0 %vm725_vm1, %v712_v58 }
 0x30a   : > { %v713_v59 = vpop.trf.xlu0 }
 0x30b   : > { %1339 = vmatprep.mubr.msk.f32.mxu0 %vm725_vm1, %v713_v59 }
 0x30e   : > { %v714_v60 = vpop.trf.xlu0 }
 0x30f   : > { %1340 = vmatmul.mubr.msk.f32.gmra.mrb[8].mxu0 %vm725_vm1, %v714_v60 }
 0x312   : > { %v715_v61 = vpop.trf.xlu0 }
 0x313   : > { %1342 = vmatprep.mubr.msk.f32.mxu0 %vm725_vm1, %v715_v61 }
 0x316   : > { %v716_v62 = vpop.trf.xlu0 }
 0x317   : > { %1343 = vmatmul.mubr.msk.f32.gmra.mrb[10].mxu0 %vm725_vm1, %v716_v62 }
 0x31a   : > { %v717_v63 = vpop.trf.xlu0 }
 0x31b   : > { %1345 = vmatprep.mubr.msk.f32.mxu0 %vm725_vm1, %v717_v63 }
 0x31e   : > { %v718_v0 = vpop.trf.xlu0 }
 0x31f   : > { %1346 = vmatmul.mubr.msk.f32.gmra.mrb[12].mxu0 %vm725_vm1, %v718_v0 }
 0x322   : > { %v719_v1 = vpop.trf.xlu0 }
 0x323   : > { %1348 = vmatprep.mubr.msk.f32.mxu0 %vm725_vm1, %v719_v1 }
 0x326   : > { %v720_v2 = vpop.trf.xlu0 }
 0x327   : > { %1349 = vmatmul.mubr.msk.f32.gmra.mrb[14].mxu0 %vm725_vm1, %v720_v2 }
 0x32a   : > { %v721_v3 = vpop.trf.xlu0 }
 0x32b   : > { %1351 = vmatprep.mubr.msk.f32.mxu0 %vm725_vm1, %v721_v3 }
 0x32e   : > { %v722_v4 = vpop.trf.xlu0 }
 0x32f   : > { %1352 = vmatmul.mubr.msk.f32.gmra.mrb[16].mxu0 %vm725_vm1, %v722_v4 }
 0x332   : > { %v723_v5 = vpop.trf.xlu0 }
 0x333   : > { %1354 = vmatprep.mubr.msk.f32.mxu0 %vm725_vm1, %v723_v5 }
 0x336   : > { %v724_v6 = vpop.trf.xlu0 }
 0x337   : > { %1355 = vmatmul.mubr.msk.f32.gmra.mrb[18].mxu0 %vm725_vm1, %v724_v6 }
 0x338   : > { %1635 = shalt.err (!%p1632_p3)
}
 0x339   : > { %s1636_s15 = scalar_lea.hbm %s2130_s2, 16  ;;  %s1640_s9 = scalar_lea.hbm %s2263_s6, 32 }
 0x33a   : > { %p1637_p9 = scmp.ne.s32.totalorder %s2130_s2, %s1636_s15  ;;  %p1641_p7 = scmp.lt.u32.totalorder %s2130_s2, %s2263_s6 }
 0x33b   : > { %p1642_p12 = scmp.lt.u32.totalorder %s1640_s9, %s1636_s15  ;;  %p1644_p2 = scmp.lt.u32.totalorder %s1636_s15, %s2130_s2 }
 0x33c   : > { %p1638_p13 = pnand %p1637_p9, %p1968_p5 }
 0x33d   : > { %p1643_p1 = por %p1642_p12, %p1641_p7 }
 0x33e   : > { %p1639_p11 = pneg %p1638_p13 }
 0x33f   : > { %p1645_p4 = por %p1644_p2, %p1643_p1 }
 0x341   : > { %p1646_p0 = pnand %p1645_p4, %p1639_p11 }
 0x343   : > { %1649 = shalt.err (!%p1646_p0)
}
 0x344   : > { %1386 = dma.vmem_to_hbm [thread:$0]  (%p1968_p5), %s975_s11, 16, %s2130_s2, %s2134_s8  }
 0x345   : > { %s1246_s29 = sshll.u32 %s1839_s28, 8  ;;  %s958_s17 = sshll.u32 %s2101_s30, 4  ;;  %s2161_s17 = int_to_ptr.vmem [resolvable:$true] %s958_s17 }
 0x346   : > { %s2159_s22 = scalar_lea.hbm %s2262_s5, %s1246_s29  ;;  %s936_s4 = scalar_lea.sflag [#allocation4], %s2063_s14 }
 0x347   : > { %s1650_s13 = scalar_lea.vmem %s2161_s17, 256  ;;  %s1772_s19 = smov [#allocation11]  }
 0x348   : > { %p1651_p8 = scmp.ne.s32.totalorder %s2161_s17, %s1650_s13  ;;  %s1654_s11 = sshll.u32 %s1772_s19, 4  ;;  %s1655_s11 = int_to_ptr.vmem [resolvable:$false] %s1654_s11 }
 0x349   : > { %s1656_s30 = scalar_lea.vmem %s1655_s11, 512  ;;  %p1657_p3 = scmp.lt.s32.totalorder %s2161_s17, %s1655_s11 }
 0x34a   : > { %p1652_p6 = pnand %p1651_p8, %p1968_p5  ;;  %p1658_p9 = scmp.lt.s32.totalorder %s1656_s30, %s1650_s13 }
 0x34c   : > { %p1653_p10 = pneg %p1652_p6  ;;  %p1659_p13 = por %p1658_p9, %p1657_p3 }
 0x34e   : > { %p1660_p11 = pnand %p1659_p13, %p1653_p10 }
 0x350   : > { %1663 = shalt.err (!%p1660_p11)
}
 0x351   : > { %s1664_s2 = scalar_lea.hbm %s2159_s22, 256  ;;  %s1668_s3 = scalar_lea.hbm %s2262_s5, 512 }
 0x352   : > { %p1665_p7 = scmp.ne.s32.totalorder %s2159_s22, %s1664_s2  ;;  %p1669_p2 = scmp.lt.u32.totalorder %s2159_s22, %s2262_s5 }
 0x353   : > { %p1670_p4 = scmp.lt.u32.totalorder %s1668_s3, %s1664_s2  ;;  %p1672_p8 = scmp.lt.u32.totalorder %s1664_s2, %s2159_s22 }
 0x354   : > { %p1666_p12 = pnand %p1665_p7, %p1968_p5 }
 0x355   : > { %p1671_p0 = por %p1670_p4, %p1669_p2 }
 0x356   : > { %p1667_p1 = pneg %p1666_p12 }
 0x357   : > { %p1673_p6 = por %p1672_p8, %p1671_p0 }
 0x359   : > { %p1674_p10 = pnand %p1673_p6, %p1667_p1 }
 0x35b   : > { %1677 = shalt.err (!%p1674_p10)
}
 0x35c   : > { %s1773_s23 = smov 64   ;;  %s1774_s29 = smov 4  }
 0x35d   : > { %1385 = dma.vmem_to_hbm [thread:$0]  (%p1968_p5), %s2161_s17, 256, %s2159_s22, %s936_s4, %s1773_s23, %s1773_s23, %s1774_s29  }
 0x35e   : > { %s1187_s16 = sshll.u32 %s2063_s14, 7  ;;  %s1247_s14 = sshll.u32 %s1839_s28, 11 }
 0x35f   : > { %s2188_s0 = scalar_lea.vmem [#allocation14], %s1187_s16  ;;  %s2209_s13 = scalar_lea.hbm %s2264_s7, %s1247_s14 }
 0x360   : > { %s987_s17 = sshll.u32 %s2188_s0, 4  ;;  %s1775_s28 = smov [#allocation14]   ;;  %s2211_s17 = int_to_ptr.vmem [resolvable:$true] %s987_s17 }
 0x361   : > { %s1678_s19 = scalar_lea.vmem %s2211_s17, 2048  ;;  %s1682_s11 = sshll.u32 %s1775_s28, 4  ;;  %s1683_s11 = int_to_ptr.vmem [resolvable:$false] %s1682_s11 }
 0x362   : > { %p1679_p3 = scmp.ne.s32.totalorder %s2211_s17, %s1678_s19  ;;  %s1684_s30 = scalar_lea.vmem %s1683_s11, 4096 }
 0x363   : > { %p1685_p11 = scmp.lt.s32.totalorder %s2211_s17, %s1683_s11  ;;  %p1686_p7 = scmp.lt.s32.totalorder %s1684_s30, %s1678_s19 }
 0x364   : > { %p1680_p9 = pnand %p1679_p3, %p1968_p5 }
 0x365   : > { %p1687_p12 = por %p1686_p7, %p1685_p11 }
 0x366   : > { %p1681_p13 = pneg %p1680_p9 }
 0x368   : > { %p1688_p1 = pnand %p1687_p12, %p1681_p13 }
 0x3d2   : > { %v1335_v7 = vpop.f32.mrb[4].mxu0 }
 0x3d3   : > { %920 = vst [vmem:[%s2188_s0 + $0x8] sm:$0xff] %v1335_v7  ;;  %v840_v8 = vpop.f32.mrb[5].mxu0 }
 0x3d4   : > { %919 = vst [vmem:[%s2188_s0] sm:$0xff] %v840_v8 }
 0x3da   : > { %v1338_v9 = vpop.f32.mrb[6].mxu0 }
 0x3db   : > { %922 = vst [vmem:[%s2188_s0 + $0x18] sm:$0xff] %v1338_v9  ;;  %v850_v10 = vpop.f32.mrb[7].mxu0 }
 0x3dc   : > { %921 = vst [vmem:[%s2188_s0 + $0x10] sm:$0xff] %v850_v10 }
 0x3e2   : > { %v1341_v11 = vpop.f32.mrb[8].mxu0 }
 0x3e3   : > { %924 = vst [vmem:[%s2188_s0 + $0x28] sm:$0xff] %v1341_v11  ;;  %v860_v12 = vpop.f32.mrb[9].mxu0 }
 0x3e4   : > { %923 = vst [vmem:[%s2188_s0 + $0x20] sm:$0xff] %v860_v12 }
 0x3ea   : > { %v1344_v13 = vpop.f32.mrb[10].mxu0 }
 0x3eb   : > { %926 = vst [vmem:[%s2188_s0 + $0x38] sm:$0xff] %v1344_v13  ;;  %v870_v14 = vpop.f32.mrb[11].mxu0 }
 0x3ec   : > { %925 = vst [vmem:[%s2188_s0 + $0x30] sm:$0xff] %v870_v14 }
 0x3f2   : > { %v1347_v15 = vpop.f32.mrb[12].mxu0 }
 0x3f3   : > { %928 = vst [vmem:[%s2188_s0 + $0x48] sm:$0xff] %v1347_v15  ;;  %v880_v16 = vpop.f32.mrb[13].mxu0 }
 0x3f4   : > { %927 = vst [vmem:[%s2188_s0 + $0x40] sm:$0xff] %v880_v16 }
 0x3fa   : > { %v1350_v17 = vpop.f32.mrb[14].mxu0 }
 0x3fb   : > { %930 = vst [vmem:[%s2188_s0 + $0x58] sm:$0xff] %v1350_v17  ;;  %v890_v18 = vpop.f32.mrb[15].mxu0 }
 0x3fc   : > { %929 = vst [vmem:[%s2188_s0 + $0x50] sm:$0xff] %v890_v18 }
 0x402   : > { %v1353_v19 = vpop.f32.mrb[16].mxu0 }
 0x403   : > { %932 = vst [vmem:[%s2188_s0 + $0x68] sm:$0xff] %v1353_v19  ;;  %v900_v20 = vpop.f32.mrb[17].mxu0 }
 0x404   : > { %931 = vst [vmem:[%s2188_s0 + $0x60] sm:$0xff] %v900_v20 }
 0x40a   : > { %v1356_v21 = vpop.f32.mrb[18].mxu0 }
 0x40b   : > { %934 = vst [vmem:[%s2188_s0 + $0x78] sm:$0xff] %v1356_v21  ;;  %v910_v22 = vpop.f32.mrb[19].mxu0 }
 0x40c   : > { %933 = vst [vmem:[%s2188_s0 + $0x70] sm:$0xff] %v910_v22 }
 0x40d   : > { %1691 = shalt.err (!%p1688_p1)
}
 0x40e   : > { %s1692_s2 = scalar_lea.hbm %s2209_s13, 2048  ;;  %s1696_s3 = scalar_lea.hbm %s2264_s7, 4096 }
 0x40f   : > { %p1693_p2 = scmp.ne.s32.totalorder %s2209_s13, %s1692_s2  ;;  %p1697_p8 = scmp.lt.u32.totalorder %s2209_s13, %s2264_s7 }
 0x410   : > { %p1698_p6 = scmp.lt.u32.totalorder %s1696_s3, %s1692_s2  ;;  %p1700_p3 = scmp.lt.u32.totalorder %s1692_s2, %s2209_s13 }
 0x411   : > { %p1694_p4 = pnand %p1693_p2, %p1968_p5 }
 0x412   : > { %p1699_p10 = por %p1698_p6, %p1697_p8 }
 0x413   : > { %p1695_p0 = pneg %p1694_p4 }
 0x414   : > { %p1701_p9 = por %p1700_p3, %p1699_p10 }
 0x416   : > { %p1702_p13 = pnand %p1701_p9, %p1695_p0 }
 0x418   : > { %1705 = shalt.err (!%p1702_p13)
}
 0x419   : > { %s1776_s23 = smov 128   ;;  %s1777_s29 = smov 8  }
 0x41a   : > { %1387 = dma.vmem_to_hbm [thread:$0]  (%p1968_p5), %s2211_s17, 2048, %s2209_s13, %s2134_s8, %s1776_s23, %s1776_s23, %s1777_s29  }
 0x41b PF: > { %s2298_s16 = sld [smem:[#allocation21_spill]]  ;;  %s1002_s0 = sand.u32 1, %s1748_s24  }
 0x41c   : > { %p2300_p7 = scmp.ge.s32.totalorder %s1760_s27, 2  ;;  %s1003_s14 = scalar_lea.sflag [#allocation4], %s1002_s0 }
 0x421   : > { %p2299_p11 = scmp.ne.s32.totalorder %s2298_s16, 0 }
 0x423   : > { %p1409_p12 = pnand %p2300_p7, %p2299_p11 }
 0x425   : > { %1739 = dma.done.wait (!%p1409_p12), %s1003_s14, 256  }
 0x426   : > { %1741 = vsyncadd (!%p1409_p12), %s1003_s14, 4294967040  ;;  %s2301_s22 = sadd.s32 4294967294, %s1760_s27  }
 0x427   : > { %s1011_s4 = sand.u32 1, %s2301_s22  }
 0x428   : > { %s1012_s19 = scalar_lea.sflag [#allocation13], %s1011_s4 }
 0x429   : > { %1743 = dma.done.wait (!%p1409_p12), %s1012_s19, 2064  }
 0x42a   : > { %1745 = vsyncadd (!%p1409_p12), %s1012_s19, 4294965232  ;;  %p28_p5 = scmp.ge.s32.totalorder %s1936_s21, 4   ;;  %s2302_s24 = smov %s1752_s25 }
 0x42b   : > { %s2303_s25 = smov %s1756_s26  ;;  %s2304_s26 = smov %s1964_s12 }
 0x42c   : > { %s2305_s27 = smov %s1936_s21  ;;  %30 = sbr.rel (!%p28_p5) target bundleno = 15 (0xf), region = 142 }
 0x433   :  { %1025 = vsyncpa [#allocation3], 1 }
 0x434   :  { %1027 = vsyncpa [#allocation3 + $0x1], 1 }
 0x435   :  { %1028 = vsyncpa [#allocation6], 1 }
 0x436   :  { %1030 = vsyncpa [#allocation6 + $0x1], 1 }
 0x437   :  { %1031 = vsyncpa [#allocation9], 1 }
 0x438   :  { %1032 = vsyncpa [#allocation4], 1 }
 0x439   :  { %1034 = vsyncpa [#allocation4 + $0x1], 1 }
 0x43a   :  { %1035 = vsyncpa [#allocation13], 1 }
 0x43b   :  { %1037 = vsyncpa [#allocation13 + $0x1], 1 }

// kernel: multi_attention_block.7
= control target key start
LH: loop header
LB: loop body
LE: loop exit
PB: predicated region body
PF: predicated region fallthrough
CT: control target
= control target key end

     0   :  { %8 = vsyncpa [#allocation3], 0  ;;  %s1039_s0 = inlined_call_operand.hbm [shape: bf16[64,128], index: 0, kind: input, shape index: {}]   ;;  %s1040_s1 = inlined_call_operand.hbm [shape: bf16[128,128], index: 1, kind: input, shape index: {}]   ;;  %s1041_s2 = inlined_call_operand.hbm [shape: f32[1,128], index: 2, kind: input, shape index: {}]   ;;  %s1042_s3 = inlined_call_operand.hbm [shape: f32[64,128], index: 3, kind: output, shape index: {}]  }
   0x1   :  { %10 = vsyncpa [#allocation3 + $0x1], 0 }
   0x2   :  { %11 = vsyncpa [#allocation6], 0 }
   0x3   :  { %12 = vsyncpa [#allocation4], 0 }
   0x4   :  { %14 = vsyncpa [#allocation4 + $0x1], 0  ;;  %s797_s12 = smov 0   ;;  %s799_s13 = smov 0  }
   0x5   :  { %s801_s14 = smov 0   ;;  %s803_s15 = smov 0  }
   0x6 LB: > { %s818_s16 = sadd.s32 4294967295, %s767_s15   ;;  %s469_s17 = sadd.s32 4294967294, %s767_s15   ;;  %s767_s15 = sphi %s803_s15, %s1062_s15   ;;  %s763_s14 = sphi %s801_s14, %s1061_s14   ;;  %s759_s13 = sphi %s799_s13, %s1060_s13   ;;  %s755_s12 = sphi %s797_s12, %s1059_s12  }
   0x7   : > { %p40_p0 = scmp.ne.s32.totalorder %s759_s13, %s755_s12  ;;  %p1043_p1 = scmp.eq.s32.totalorder %s818_s16, 0 }
   0x8   : > { %p112_p3 = scmp.eq.s32.totalorder %s469_s17, 1  ;;  %p470_p5 = scmp.ge.s32.totalorder %s767_s15, 1 }
   0x9   : > { %p827_p4 = por %p1043_p1, %p40_p0  ;;  %p119_p7 = scmp.lt.s32.totalorder %s767_s15, 3 }
   0xa   : > { %p832_p6 = por %p112_p3, %p40_p0  ;;  %s769_s21 = smov [#allocation5]  }
   0xb   : > { %s1046_s18 = scalar_select %p827_p4, 1, 0 }
   0xc   : > { %s1047_s19 = scalar_select %p832_p6, 1, 0 }
   0xd   : > { %p837_p8 = pnand %p470_p5, %p119_p7  ;;  %s131_s22 = sshll.u32 %s769_s21, 4  ;;  %s841_s22 = int_to_ptr.vmem [resolvable:$true] %s131_s22 }
   0xe   : > { %s770_s24 = smov [#allocation7]   ;;  %s611_s28 = scalar_lea.hbm %s1040_s1, 1024 }
   0xf   : > { %p542_p9 = pneg %p837_p8  ;;  %s145_s25 = sshll.u32 %s770_s24, 4  ;;  %s852_s25 = int_to_ptr.vmem [resolvable:$true] %s145_s25 }
  0x10   : > { %p612_p12 = scmp.ne.s32.totalorder %s1040_s1, %s611_s28  ;;  %p618_p5 = scmp.lt.u32.totalorder %s611_s28, %s1040_s1 }
  0x11   : > { %p848_p11 = pnand %p542_p9, %p1043_p1 }
  0x13   : > { %p613_p13 = pneg %p848_p11 }
  0x15   : > { %p614_p0 = pnand %p613_p13, %p612_p12 }
  0x17   : > { %p615_p3 = pneg %p614_p0 }
  0x19   : > { %p620_p7 = pnand %p618_p5, %p615_p3 }
  0x1b   : > { %623 = shalt.err (!%p620_p7)
}
  0x1c   : > { %s624_s6 = scalar_lea.vmem %s841_s22, 1024  ;;  %p632_p2 = scmp.lt.s32.totalorder %s841_s22, %s841_s22 }
  0x1d   : > { %p625_p9 = scmp.ne.s32.totalorder %s841_s22, %s624_s6  ;;  %p633_p12 = scmp.lt.s32.totalorder %s624_s6, %s624_s6 }
  0x1f   : > { %p627_p10 = pnand %p625_p9, %p613_p13  ;;  %p634_p0 = por %p633_p12, %p632_p2 }
  0x21   : > { %p628_p1 = pneg %p627_p10 }
  0x23   : > { %p635_p6 = pnand %p634_p0, %p628_p1 }
  0x25   : > { %638 = shalt.err (!%p635_p6)
}
  0x26   : > { %s771_s7 = smov 64   ;;  %s772_s8 = smov 4  }
  0x27   : > { %545 = dma.hbm_to_vmem [thread:$0]  (!%p848_p11), %s1040_s1, 1024, %s841_s22, [#allocation6], %s771_s7, %s771_s7, %s772_s8  }
  0x28   : > { %s639_s21 = scalar_lea.hbm %s1041_s2, 16 }
  0x29   : > { %p640_p1 = scmp.ne.s32.totalorder %s1041_s2, %s639_s21  ;;  %p646_p10 = scmp.lt.u32.totalorder %s639_s21, %s1041_s2 }
  0x2b   : > { %p642_p2 = pnand %p640_p1, %p613_p13 }
  0x2d   : > { %p643_p6 = pneg %p642_p2 }
  0x2f   : > { %p648_p3 = pnand %p646_p10, %p643_p6 }
  0x31   : > { %651 = shalt.err (!%p648_p3)
}
  0x32   : > { %s652_s22 = scalar_lea.vmem %s852_s25, 16  ;;  %s659_s29 = scalar_lea.vmem %s852_s25, 32 }
  0x33   : > { %p653_p5 = scmp.ne.s32.totalorder %s852_s25, %s652_s22  ;;  %p660_p12 = scmp.lt.s32.totalorder %s852_s25, %s852_s25 }
  0x34   : > { %p661_p0 = scmp.lt.s32.totalorder %s659_s29, %s652_s22 }
  0x35   : > { %p655_p7 = pnand %p653_p5, %p613_p13 }
  0x36   : > { %p662_p1 = por %p661_p0, %p660_p12 }
  0x37   : > { %p656_p9 = pneg %p655_p7 }
  0x39   : > { %p663_p2 = pnand %p662_p1, %p656_p9 }
  0x3b   : > { %666 = shalt.err (!%p663_p2)
}
  0x3c   : > { %548 = dma.hbm_to_vmem [thread:$0]  (!%p848_p11), %s1041_s2, 16, %s852_s25, [#allocation6]  }
  0x3d   : > { %s911_s5 = sadd.s32 1, %s767_s15   ;;  %s27_s23 = sadd.s32 1, %s763_s14 }
  0x3e   : > { %s24_s6 = ssub.s32 %s767_s15, %s911_s5  ;;  %p34_p13 = scmp.ne.s32.totalorder %s763_s14, %s759_s13 }
  0x3f   : > { %p25_p6 = scmp.eq.s32.totalorder %s24_s6, 0  ;;  %p35_p10 = scmp.eq.s32.totalorder %s767_s15, 0 }
  0x40   : > { %p1050_p3 = scmp.eq.s32.totalorder %s818_s16, 1  ;;  %p559_p7 = scmp.lt.s32.totalorder %s767_s15, 2 }
  0x41   : > { %s927_s10 = scalar_select %p25_p6, %s763_s14, %s27_s23  }
  0x42   : > { %p921_p5 = por %p1050_p3, %p34_p13  ;;  %p36_p9 = por %p35_p10, %p34_p13 }
  0x43   : > { %s156_s11 = sand.u32 1, %s763_s14   ;;  %s498_s25 = sshll.u32 %s767_s15, 8 }
  0x44   : > { %s1051_s9 = scalar_select %p921_p5, 1, 0 }
  0x45   : > { %s474_s17 = sshll.u32 %s156_s11, 4  ;;  %s934_s26 = scalar_lea.hbm %s1039_s0, %s498_s25 }
  0x46   : > { %s160_s27 = scalar_lea.vmem [#allocation2], %s474_s17  ;;  %p938_p11 = pnand %p559_p7, %p36_p9 }
  0x47   : > { %s167_s28 = sshll.u32 %s160_s27, 4  ;;  %s942_s29 = scalar_lea.sflag [#allocation3], %s156_s11  ;;  %s936_s28 = int_to_ptr.vmem [resolvable:$true] %s167_s28 }
  0x48   : > { %s667_s30 = scalar_lea.hbm %s934_s26, 256  ;;  %p669_p0 = pneg %p938_p11 }
  0x49   : > { %p668_p12 = scmp.ne.s32.totalorder %s934_s26, %s667_s30  ;;  %s672_s6 = scalar_lea.hbm %s1039_s0, 512 }
  0x4a   : > { %p673_p13 = scmp.lt.u32.totalorder %s934_s26, %s1039_s0  ;;  %p674_p6 = scmp.lt.u32.totalorder %s672_s6, %s667_s30 }
  0x4b   : > { %p670_p1 = pnand %p669_p0, %p668_p12  ;;  %p676_p3 = scmp.lt.u32.totalorder %s667_s30, %s934_s26 }
  0x4c   : > { %p675_p10 = por %p674_p6, %p673_p13 }
  0x4d   : > { %p671_p2 = pneg %p670_p1 }
  0x4e   : > { %p677_p7 = por %p676_p3, %p675_p10 }
  0x50   : > { %p678_p9 = pnand %p677_p7, %p671_p2 }
  0x52   : > { %681 = shalt.err (!%p678_p9)
}
  0x53   : > { %s682_s11 = scalar_lea.vmem %s936_s28, 256  ;;  %s773_s21 = smov [#allocation2]  }
  0x54   : > { %p683_p12 = scmp.ne.s32.totalorder %s936_s28, %s682_s11  ;;  %s687_s24 = sshll.u32 %s773_s21, 4  ;;  %s688_s24 = int_to_ptr.vmem [resolvable:$false] %s687_s24 }
  0x55   : > { %s689_s27 = scalar_lea.vmem %s688_s24, 512  ;;  %p690_p4 = scmp.lt.s32.totalorder %s936_s28, %s688_s24 }
  0x56   : > { %p685_p1 = pnand %p683_p12, %p669_p0  ;;  %p691_p13 = scmp.lt.s32.totalorder %s689_s27, %s682_s11 }
  0x58   : > { %p686_p5 = pneg %p685_p1  ;;  %p692_p6 = por %p691_p13, %p690_p4 }
  0x5a   : > { %p693_p10 = pnand %p692_p6, %p686_p5 }
  0x5c   : > { %696 = shalt.err (!%p693_p10)
}
  0x5d   : > { %552 = dma.hbm_to_vmem [thread:$0]  (!%p938_p11), %s934_s26, 256, %s936_s28, %s942_s29, %s771_s7, %s771_s7, %s772_s8  }
  0x5e   : > { %179 = sbr.rel (%p837_p8) target bundleno = 372 (0x174), region = 32  ;;  %s976_s30 = sand.u32 (!%p837_p8), 1, %s759_s13  }
  0x5f   : > { %s478_s4 = sshll.u32 (!%p837_p8), %s976_s30, 4  ;;  %s182_s23 = scalar_lea.sflag (!%p837_p8), [#allocation3], %s976_s30 }
  0x60   : > { %s185_s6 = scalar_lea.vmem (!%p837_p8), [#allocation2], %s478_s4  ;;  %p1053_p4 = scmp.ne.s32.totalorder (!%p837_p8), %s1046_s18, 0 }
  0x65   : > { %742 = dma.done.wait (%p1053_p4), %s182_s23, 256  }
  0x66   : > { %744 = vsyncadd (%p1053_p4), %s182_s23, 4294967040  ;;  %p1054_p5 = scmp.eq.s32.totalorder %s818_s16, 0 }
  0x68   : > { %746 = dma.done.wait (%p1054_p5), [#allocation6], 1040   ;;  %p1055_p11 = pmov %p1054_p5 }
  0x69   : > { %v601_v0 = vld [vmem:[#allocation5] sm:$0xff]   ;;  %v602_v1 = vld [vmem:[#allocation5 + $0x8] sm:$0xff]   ;;  %v603_v2 = vld [vmem:[#allocation5 + $0x10] sm:$0xff]   ;;  %s481_s18 = sshll.u32 %s976_s30, 5  ;;  %s499_s8 = sshll.u32 %s818_s16, 9 }
  0x6a   : > { %748 = vsyncadd (%p1055_p11), [#allocation6], 4294966256  ;;  %510 = vmatprep.subr.bf16.mxu0 %v601_v0  ;;  %v604_v3 = vld [vmem:[#allocation5 + $0x18] sm:$0xff]   ;;  %v609_v4 = vld [vmem:[%s185_s6] sm:$0xff]   ;;  %s215_s20 = scalar_lea.vmem [#allocation8], %s481_s18  ;;  %s995_s22 = scalar_lea.hbm %s1042_s3, %s499_s8 }
  0x6b   : > { %511 = vmatpush3.bf16.msra.mxu0 %v601_v0  ;;  %526 = vmatprep.mubr.bf16.mxu0 %v609_v4  ;;  %v605_v5 = vld [vmem:[#allocation5 + $0x20] sm:$0xff]   ;;  %v606_v6 = vld [vmem:[#allocation5 + $0x28] sm:$0xff]   ;;  %v607_v7 = vld [vmem:[#allocation5 + $0x30] sm:$0xff]   ;;  %s377_s7 = sshll.u32 %s215_s20, 4  ;;  %s364_s16 = scalar_lea.sflag [#allocation4], %s976_s30  ;;  %s990_s7 = int_to_ptr.vmem [resolvable:$true] %s377_s7 }
  0x6c   : > { %512 = vmatprep.subr.bf16.mxu0 %v602_v1  ;;  %v608_v8 = vld [vmem:[#allocation5 + $0x38] sm:$0xff]   ;;  %v482_v10 = vld [vmem:[#allocation7] ss:$0 sm:$0xff]  ;;  %s697_s29 = scalar_lea.vmem %s990_s7, 512  ;;  %p1056_p0 = scmp.ne.s32.totalorder %s1051_s9, 0 }
  0x6d   : > { %v610_v9 = vld [vmem:[%s185_s6 + $0x8] sm:$0xff]   ;;  %p698_p8 = scmp.ne.s32.totalorder %s990_s7, %s697_s29  ;;  %s774_s17 = smov [#allocation8]  }
  0x6e   : > { %s701_s25 = sshll.u32 %s774_s17, 4  ;;  %s702_s25 = int_to_ptr.vmem [resolvable:$false] %s701_s25 }
  0x6f   : > { %513 = vmatpush3.bf16.msra.mxu0 %v602_v1  ;;  %p699_p2 = pnand %p698_p8, %p1056_p0  ;;  %s703_s11 = scalar_lea.vmem %s702_s25, 1024 }
  0x70   : > { %514 = vmatprep.subr.bf16.mxu0 %v603_v2  ;;  %p704_p7 = scmp.lt.s32.totalorder %s990_s7, %s702_s25  ;;  %p705_p9 = scmp.lt.s32.totalorder %s703_s11, %s697_s29 }
  0x71   : > { %p700_p3 = pneg %p699_p2 }
  0x72   : > { %p706_p12 = por %p705_p9, %p704_p7 }
  0x73   : > { %515 = vmatpush3.bf16.msra.mxu0 %v603_v2 }
  0x74   : > { %516 = vmatprep.subr.bf16.mxu0 %v604_v3  ;;  %p707_p1 = pnand %p706_p12, %p700_p3 }
  0x77   : > { %517 = vmatpush3.bf16.msra.mxu0 %v604_v3 }
  0x78   : > { %518 = vmatprep.subr.bf16.mxu0 %v605_v5 }
  0x7b   : > { %519 = vmatpush3.bf16.msra.mxu0 %v605_v5 }
  0x7c   : > { %520 = vmatprep.subr.bf16.mxu0 %v606_v6 }
  0x7f   : > { %521 = vmatpush3.bf16.msra.mxu0 %v606_v6 }
  0x80   : > { %522 = vmatprep.subr.bf16.mxu0 %v607_v7 }
  0x83   : > { %523 = vmatpush3.bf16.msra.mxu0 %v607_v7 }
  0x84   : > { %524 = vmatprep.subr.bf16.mxu0 %v608_v8 }
  0x87   : > { %525 = vmatpush3.bf16.msra.mxu0 %v608_v8 }
  0x8a   : > { %527 = vmatmul.mubr.bf16.vlgmr.msra.gmra.mrb[0].mxu0 %v610_v9 }
 0x15d   : > { %v528_v11 = vpop.f32.mrb[0].mxu0 }
 0x15e   : > { %v349_v12 = vadd.f32 %v528_v11, %v482_v10  ;;  %v340_v13 = vpop.f32.mrb[1].mxu0 }
 0x15f   : > { %v341_v14 = vadd.f32 %v482_v10, %v340_v13  ;;  %v529_v15 = vpop.f32.mrb[2].mxu0 }
 0x160   : > { %v357_v16 = vmax.f32 %v349_v12, 0.0  ;;  %v352_v17 = vadd.f32 %v529_v15, %v482_v10  ;;  %v343_v18 = vpop.f32.mrb[3].mxu0 }
 0x161   : > { %v355_v19 = vmax.f32 %v341_v14, 0.0  ;;  %v344_v20 = vadd.f32 %v482_v10, %v343_v18 }
 0x162   : > { %361 = vst [vmem:[%s215_s20 + $0x10] sm:$0xff] %v357_v16  ;;  %v358_v21 = vmax.f32 %v352_v17, 0.0 }
 0x163   : > { %359 = vst [vmem:[%s215_s20] sm:$0xff] %v355_v19  ;;  %v356_v22 = vmax.f32 %v344_v20, 0.0 }
 0x164   : > { %362 = vst [vmem:[%s215_s20 + $0x18] sm:$0xff] %v358_v21 }
 0x165   : > { %360 = vst [vmem:[%s215_s20 + $0x8] sm:$0xff] %v356_v22 }
 0x166   : > { %710 = shalt.err (!%p707_p1)
}
 0x167   : > { %s711_s21 = scalar_lea.hbm %s995_s22, 512  ;;  %s715_s4 = scalar_lea.hbm %s1042_s3, 1024 }
 0x168   : > { %p712_p13 = scmp.ne.s32.totalorder %s995_s22, %s711_s21  ;;  %p716_p4 = scmp.lt.u32.totalorder %s995_s22, %s1042_s3 }
 0x169   : > { %p717_p5 = scmp.lt.u32.totalorder %s715_s4, %s711_s21  ;;  %p719_p8 = scmp.lt.u32.totalorder %s711_s21, %s995_s22 }
 0x16a   : > { %p713_p6 = pnand %p712_p13, %p1056_p0 }
 0x16b   : > { %p718_p11 = por %p717_p5, %p716_p4 }
 0x16c   : > { %p714_p10 = pneg %p713_p6 }
 0x16d   : > { %p720_p2 = por %p719_p8, %p718_p11 }
 0x16f   : > { %p721_p3 = pnand %p720_p2, %p714_p10 }
 0x171   : > { %724 = shalt.err (!%p721_p3)
}
 0x172   : > { %s775_s18 = smov 128   ;;  %s776_s20 = smov 8  }
 0x173   : > { %540 = dma.vmem_to_hbm [thread:$0]  (%p1056_p0), %s990_s7, 512, %s995_s22, %s364_s16, %s775_s18, %s775_s18, %s776_s20  }
 0x174 PF: > { %s392_s8 = sand.u32 1, %s755_s12   ;;  %p1057_p7 = scmp.ne.s32.totalorder %s1047_s19, 0 }
 0x175   : > { %p1058_p9 = scmp.ge.s32.totalorder %s767_s15, 2  ;;  %s393_s26 = scalar_lea.sflag [#allocation4], %s392_s8 }
 0x177   : > { %p554_p12 = pnand %p1058_p9, %p1057_p7 }
 0x179   : > { %750 = dma.done.wait (!%p554_p12), %s393_s26, 512  }
 0x17a   : > { %752 = vsyncadd (!%p554_p12), %s393_s26, 4294966784  ;;  %p17_p1 = scmp.ge.s32.totalorder %s911_s5, 4   ;;  %s1059_s12 = smov %s759_s13 }
 0x17b   : > { %s1060_s13 = smov %s763_s14  ;;  %s1061_s14 = smov %s927_s10 }
 0x17c   : > { %s1062_s15 = smov %s911_s5  ;;  %19 = sbr.rel (!%p17_p1) target bundleno = 6 (0x6), region = 85 }
 0x183   :  { %398 = vsyncpa [#allocation3], 1 }
 0x184   :  { %400 = vsyncpa [#allocation3 + $0x1], 1 }
 0x185   :  { %401 = vsyncpa [#allocation6], 1 }
 0x186   :  { %402 = vsyncpa [#allocation4], 1 }
 0x187   :  { %404 = vsyncpa [#allocation4 + $0x1], 1 }

</bundles_post_ra>
